<compile_context>
chip_gen: v6e
topology: v6e:2x2x1
jax: 0.10.0
libtpu: 0.0.40
codegen_flags: <defaults>
</compile_context>

<pallas_src>
import functools

import jax
import jax.numpy as jnp
from jax.experimental import pallas as pl
from jax.experimental.pallas import tpu as pltpu


# ----------------------------------------------------------------------------- helpers
def _round_up(n, m):
    return ((n + m - 1) // m) * m


def _pad2(a, rows, cols):
    r, c = a.shape
    return jnp.pad(a, ((0, rows - r), (0, cols - c)))


# ----------------------------------------------------------------------------- kernel
def _mcd_vae_kernel(
    x_ref,                         # (TB, O)            input batch tile
    w1_ref, b1_ref,                # encoder linear 1:  O  -> I
    w2_ref, b2_ref,                # encoder linear 2:  I  -> H
    wmv_ref, bmv_ref,              # fused latent head: H  -> 2L   ([mean | logvar])
    wd1_ref, bd1_ref,              # decoder linear 1:  L  -> H
    wd2_ref, bd2_ref,              # decoder linear 2:  H  -> I
    wd3_ref, bd3_ref,              # decoder linear 3:  I  -> O
    eps_ref,                       # (S, TB, L)  reparameterization noise ~ N(0,1)
    m1_ref,                        # (S, TB, H)  inverted-dropout mask (pre-scaled by 1/keep)
    m2_ref,                        # (S, TB, I)  inverted-dropout mask (pre-scaled by 1/keep)
    xrec_ref,                      # (S, TB, O)  reconstructed samples
    mv_ref,                        # (TB, 2L)    [mean | logvar]
    *,
    l_pad: int,
    num_samples: int,
    compute_dtype,
):
    f32 = jnp.float32
    cdt = compute_dtype

    # ---- encoder: computed once per batch tile, reused for every MC sample ----
    x = x_ref[...].astype(cdt)
    h1 = jnp.dot(x, w1_ref[...], preferred_element_type=f32) + b1_ref[...]
    h1 = jnp.maximum(h1, 0.0)
    h2 = jnp.dot(h1.astype(cdt), w2_ref[...], preferred_element_type=f32) + b2_ref[...]
    h2 = jnp.maximum(h2, 0.0)

    # ---- fused [mean | logvar] head: one lane-dense matmul + one lane-dense store ----
    mv = jnp.dot(h2.astype(cdt), wmv_ref[...], preferred_element_type=f32) + bmv_ref[...]
    mv_ref[...] = mv

    mean = mv[:, :l_pad]                       # 128-lane aligned slices
    std = jnp.exp(mv[:, l_pad:] * 0.5)

    # ---- decoder: one stochastic pass per MC sample (weights stay VMEM-resident) ----
    for s in range(num_samples):               # static unroll; num_samples is a Python int
        z = mean + std * eps_ref[s]
        d1 = jnp.dot(z.astype(cdt), wd1_ref[...], preferred_element_type=f32) + bd1_ref[...]
        d1 = d1 * m1_ref[s]
        d2 = jnp.dot(d1.astype(cdt), wd2_ref[...], preferred_element_type=f32) + bd2_ref[...]
        d2 = d2 * m2_ref[s]
        d3 = jnp.dot(d2.astype(cdt), wd3_ref[...], preferred_element_type=f32) + bd3_ref[...]
        # sigmoid via tanh: single EUP push, result exactly inside [0, 1]
        xrec_ref[s] = 0.5 * jnp.tanh(d3 * 0.5) + 0.5


# ---------------------------------------------------------------------------- wrapper
def mcd_vae_forward(x, params, key, *, dropout=0.1, num_samples=1,
                    block_b=512, compute_dtype=jnp.bfloat16):
    """MCD-VAE forward -> (x_reconstructed, mean, log_variance).

    x: (B, origin_dim) float32.  params: dict of (in,out) weights / (1,out) biases.
    key: jax PRNG key driving reparameterization noise and MC-dropout masks.
    num_samples: number of stochastic decoder samples computed inside the kernel
      (encoder runs once).  num_samples==1 returns x_rec of shape (B, origin_dim).
    """
    B, origin_dim = x.shape
    h2_dim, latent_dim = params["wm"].shape
    inter_dim = params["w1"].shape[1]
    keep = 1.0 - float(dropout)
    S = int(num_samples)
    f32 = jnp.float32
    cdt = compute_dtype

    # lane-dense padded feature dims (multiples of 128)
    O = _round_up(origin_dim, 128)
    I = _round_up(inter_dim, 128)
    H = _round_up(h2_dim, 128)
    L = _round_up(latent_dim, 128)

    # batch tile: multiple of 8 sublanes; as large as the batch allows (amortize step cost)
    tb = max(8, (min(block_b, _round_up(B, 8)) // 8) * 8)
    b_pad = _round_up(B, tb)
    grid = (b_pad // tb,)

    # --- padded / fused weights; matmul operands in compute_dtype, biases stay f32 ---
    w1 = _pad2(params["w1"], O, I).astype(cdt)
    b1 = _pad2(params["b1"], 1, I).astype(f32)
    w2 = _pad2(params["w2"], I, H).astype(cdt)
    b2 = _pad2(params["b2"], 1, H).astype(f32)
    wmv = jnp.concatenate(
        [_pad2(params["wm"], H, L), _pad2(params["wv"], H, L)], axis=1).astype(cdt)
    bmv = jnp.concatenate(
        [_pad2(params["bm"], 1, L), _pad2(params["bv"], 1, L)], axis=1).astype(f32)
    wd1 = _pad2(params["wd1"], L, H).astype(cdt)
    bd1 = _pad2(params["bd1"], 1, H).astype(f32)
    wd2 = _pad2(params["wd2"], H, I).astype(cdt)
    bd2 = _pad2(params["bd2"], 1, I).astype(f32)
    wd3 = _pad2(params["wd3"], I, O).astype(cdt)
    bd3 = _pad2(params["bd3"], 1, O).astype(f32)

    xp = _pad2(x.astype(f32), b_pad, O)

    # --- host-side randomness (torch.randn_like / nn.Dropout inverted-scaling semantics) ---
    k_eps, k_m1, k_m2 = jax.random.split(key, 3)
    eps = jax.random.normal(k_eps, (S, b_pad, L), f32)
    if keep < 1.0:
        m1 = jax.random.bernoulli(k_m1, keep, (S, b_pad, H)).astype(f32) * (1.0 / keep)
        m2 = jax.random.bernoulli(k_m2, keep, (S, b_pad, I)).astype(f32) * (1.0 / keep)
    else:
        m1 = jnp.ones((S, b_pad, H), f32)
        m2 = jnp.ones((S, b_pad, I), f32)

    # --- BlockSpecs: activations stream (batch-tiled); weights resident (index 0,0) ---
    tile2 = lambda i: (i, 0)
    tile3 = lambda i: (0, i, 0)
    resident = lambda i: (0, 0)

    def wspec(a):
        return pl.BlockSpec(a.shape, resident)

    in_specs = [
        pl.BlockSpec((tb, O), tile2),                 # x
        wspec(w1), wspec(b1),
        wspec(w2), wspec(b2),
        wspec(wmv), wspec(bmv),
        wspec(wd1), wspec(bd1),
        wspec(wd2), wspec(bd2),
        wspec(wd3), wspec(bd3),
        pl.BlockSpec((S, tb, L), tile3),              # eps
        pl.BlockSpec((S, tb, H), tile3),              # dropout mask 1
        pl.BlockSpec((S, tb, I), tile3),              # dropout mask 2
    ]
    out_specs = (
        pl.BlockSpec((S, tb, O), tile3),              # x_rec (lane-dense)
        pl.BlockSpec((tb, 2 * L), tile2),             # [mean | logvar] (lane-dense)
    )
    out_shape = (
        jax.ShapeDtypeStruct((S, b_pad, O), f32),
        jax.ShapeDtypeStruct((b_pad, 2 * L), f32),
    )

    # --- explicit VMEM budget: resident weights + double-buffered streamed blocks ---
    weights = (w1, b1, w2, b2, wmv, bmv, wd1, bd1, wd2, bd2, wd3, bd3)
    weight_bytes = sum(int(a.size) * a.dtype.itemsize for a in weights)
    stream_bytes = 4 * (tb * O + S * tb * (L + H + I) + S * tb * O + tb * 2 * L)
    act_bytes = 4 * tb * (I + H + 2 * L + H + I + O) * 2
    needed = 2 * (weight_bytes + stream_bytes) + act_bytes
    vmem_limit = int(min(64 * 1024 * 1024, max(needed + (4 << 20), 32 * 1024 * 1024)))

    kernel = functools.partial(
        _mcd_vae_kernel, l_pad=L, num_samples=S, compute_dtype=cdt)

    xrec, mv = pl.pallas_call(
        kernel,
        out_shape=out_shape,
        grid_spec=pltpu.PrefetchScalarGridSpec(
            num_scalar_prefetch=0,
            grid=grid,
            in_specs=in_specs,
            out_specs=out_specs,
        ),
        compiler_params=pltpu.CompilerParams(
            dimension_semantics=("parallel",),        # v7x: batch tiles shard across both TCs
            vmem_limit_bytes=vmem_limit,
        ),
    )(xp, w1, b1, w2, b2, wmv, bmv, wd1, bd1, wd2, bd2, wd3, bd3, eps, m1, m2)

    xrec = xrec[:, :B, :origin_dim]
    mean = mv[:B, :latent_dim]
    logvar = mv[:B, L:L + latent_dim]
    if S == 1:
        xrec = xrec[0]
    return xrec, mean, logvar


# ------------------------------------------------------------------------ param setup
def _linear_params(key, in_features, out_features):
    """PyTorch nn.Linear default init: U(-1/sqrt(in), 1/sqrt(in)); weight stored (in, out)."""
    kw, kb = jax.random.split(key)
    bound = 1.0 / (in_features ** 0.5)
    w = jax.random.uniform(kw, (in_features, out_features), jnp.float32, -bound, bound)
    b = jax.random.uniform(kb, (1, out_features), jnp.float32, -bound, bound)
    return w, b


def make_params(key, origin_dim, intermediate_dim, latent_dim):
    h2 = intermediate_dim // 2
    keys = jax.random.split(key, 7)
    w1, b1 = _linear_params(keys[0], origin_dim, intermediate_dim)
    w2, b2 = _linear_params(keys[1], intermediate_dim, h2)
    wm, bm = _linear_params(keys[2], h2, latent_dim)
    wv, bv = _linear_params(keys[3], h2, latent_dim)
    wd1, bd1 = _linear_params(keys[4], latent_dim, h2)
    wd2, bd2 = _linear_params(keys[5], h2, intermediate_dim)
    wd3, bd3 = _linear_params(keys[6], intermediate_dim, origin_dim)
    return dict(
        w1=w1, b1=b1, w2=w2, b2=b2, wm=wm, bm=bm, wv=wv, bv=bv,
        wd1=wd1, bd1=bd1, wd2=wd2, bd2=bd2, wd3=wd3, bd3=bd3,
    )


# ----------------------------------------------------------------------------- main
if __name__ == "__main__":
    batch = 64
    origin_dim = 16
    intermediate_dim = 32
    latent_dim = 8
    dropout_p = 0.1

    root = jax.random.PRNGKey(0)
    k_params, k_x, k_rng1, k_rng2 = jax.random.split(root, 4)

    params = make_params(k_params, origin_dim, intermediate_dim, latent_dim)
    x = jax.random.uniform(k_x, (batch, origin_dim), jnp.float32)

    # pure-JAX reference for the deterministic encoder + latent heads
    h1 = jnp.maximum(x @ params["w1"] + params["b1"], 0.0)
    h2 = jnp.maximum(h1 @ params["w2"] + params["b2"], 0.0)
    r_mean = h2 @ params["wm"] + params["bm"]
    r_logvar = h2 @ params["wv"] + params["bv"]

    # ---- run 1: f32 matmul operands -> parity of the deterministic path ----
    x_rec, mean, variance = mcd_vae_forward(
        x, params, k_rng1, dropout=dropout_p, num_samples=1,
        compute_dtype=jnp.float32)
    jax.block_until_ready((x_rec, mean, variance))

    assert jnp.allclose(mean, r_mean, atol=2e-3, rtol=2e-3), "mean mismatch"
    assert jnp.allclose(variance, r_logvar, atol=2e-3, rtol=2e-3), "variance mismatch"
    assert x_rec.shape == (batch, origin_dim)
    assert bool(jnp.all(jnp.isfinite(x_rec)))
    assert bool(jnp.all((x_rec >= 0.0) & (x_rec <= 1.0 + 1e-5)))

    # determinism for a fixed key
    x_rec_b, mean_b, variance_b = mcd_vae_forward(
        x, params, k_rng1, dropout=dropout_p, num_samples=1,
        compute_dtype=jnp.float32)
    jax.block_until_ready((x_rec_b, mean_b, variance_b))
    assert jnp.array_equal(x_rec, x_rec_b), "non-deterministic for fixed key"
    assert jnp.array_equal(mean, mean_b) and jnp.array_equal(variance, variance_b)

    # ---- run 2: default bf16 MXU operands + 3 MC samples amortized in-kernel ----
    x_mc, mean_mc, var_mc = mcd_vae_forward(
        x, params, k_rng2, dropout=dropout_p, num_samples=3)
    jax.block_until_ready((x_mc, mean_mc, var_mc))
    assert x_mc.shape == (3, batch, origin_dim)
    assert bool(jnp.all(jnp.isfinite(x_mc)))
    assert bool(jnp.all((x_mc >= 0.0) & (x_mc <= 1.0 + 1e-5)))
    assert jnp.allclose(mean_mc, r_mean, atol=1e-1, rtol=1e-1), "bf16 mean too far off"

    print("KERNEL_OK")
</pallas_src>

<mosaic_0001>
module attributes {stable_mosaic.version = 11 : i64} {
  func.func @_mcd_vae_kernel(%arg0: i32, %arg1: memref<64x128xf32, #tpu.memory_space<vmem>>, %arg2: memref<128x128xf32, #tpu.memory_space<vmem>>, %arg3: memref<1x128xf32, #tpu.memory_space<vmem>>, %arg4: memref<128x128xf32, #tpu.memory_space<vmem>>, %arg5: memref<1x128xf32, #tpu.memory_space<vmem>>, %arg6: memref<128x256xf32, #tpu.memory_space<vmem>>, %arg7: memref<1x256xf32, #tpu.memory_space<vmem>>, %arg8: memref<128x128xf32, #tpu.memory_space<vmem>>, %arg9: memref<1x128xf32, #tpu.memory_space<vmem>>, %arg10: memref<128x128xf32, #tpu.memory_space<vmem>>, %arg11: memref<1x128xf32, #tpu.memory_space<vmem>>, %arg12: memref<128x128xf32, #tpu.memory_space<vmem>>, %arg13: memref<1x128xf32, #tpu.memory_space<vmem>>, %arg14: memref<1x64x128xf32, #tpu.memory_space<vmem>>, %arg15: memref<1x64x128xf32, #tpu.memory_space<vmem>>, %arg16: memref<1x64x128xf32, #tpu.memory_space<vmem>>, %arg17: memref<1x64x128xf32, #tpu.memory_space<vmem>>, %arg18: memref<64x256xf32, #tpu.memory_space<vmem>>) attributes {dimension_semantics = [#tpu.dimension_semantics<parallel>], iteration_bounds = array<i64: 1>, scalar_prefetch = 0 : i64, scratch_operands = 0 : i64, tpu.core_type = #tpu.core_type<tc>, window_params = [{transform_indices = @transform_0, window_bounds = array<i64: 64, 128>}, {pipeline_mode = #tpu.pipeline_mode<synchronous>, transform_indices = @transform_1, window_bounds = array<i64: 128, 128>}, {pipeline_mode = #tpu.pipeline_mode<synchronous>, transform_indices = @transform_2, window_bounds = array<i64: 1, 128>}, {pipeline_mode = #tpu.pipeline_mode<synchronous>, transform_indices = @transform_3, window_bounds = array<i64: 128, 128>}, {pipeline_mode = #tpu.pipeline_mode<synchronous>, transform_indices = @transform_4, window_bounds = array<i64: 1, 128>}, {pipeline_mode = #tpu.pipeline_mode<synchronous>, transform_indices = @transform_5, window_bounds = array<i64: 128, 256>}, {pipeline_mode = #tpu.pipeline_mode<synchronous>, transform_indices = @transform_6, window_bounds = array<i64: 1, 256>}, {pipeline_mode = #tpu.pipeline_mode<synchronous>, transform_indices = @transform_7, window_bounds = array<i64: 128, 128>}, {pipeline_mode = #tpu.pipeline_mode<synchronous>, transform_indices = @transform_8, window_bounds = array<i64: 1, 128>}, {pipeline_mode = #tpu.pipeline_mode<synchronous>, transform_indices = @transform_9, window_bounds = array<i64: 128, 128>}, {pipeline_mode = #tpu.pipeline_mode<synchronous>, transform_indices = @transform_10, window_bounds = array<i64: 1, 128>}, {pipeline_mode = #tpu.pipeline_mode<synchronous>, transform_indices = @transform_11, window_bounds = array<i64: 128, 128>}, {pipeline_mode = #tpu.pipeline_mode<synchronous>, transform_indices = @transform_12, window_bounds = array<i64: 1, 128>}, {transform_indices = @transform_13, window_bounds = array<i64: 1, 64, 128>}, {transform_indices = @transform_14, window_bounds = array<i64: 1, 64, 128>}, {transform_indices = @transform_15, window_bounds = array<i64: 1, 64, 128>}, {transform_indices = @transform_16, window_bounds = array<i64: 1, 64, 128>}, {transform_indices = @transform_17, window_bounds = array<i64: 64, 256>}]} {
    %c0 = arith.constant 0 : index
    %c0_0 = arith.constant 0 : index
    %0 = vector.load %arg1[%c0, %c0_0] : memref<64x128xf32, #tpu.memory_space<vmem>>, vector<64x128xf32>
    %c0_1 = arith.constant 0 : index
    %c0_2 = arith.constant 0 : index
    %1 = vector.load %arg2[%c0_1, %c0_2] : memref<128x128xf32, #tpu.memory_space<vmem>>, vector<128x128xf32>
    %cst = arith.constant dense<0.000000e+00> : vector<64x128xf32>
    %2 = tpu.matmul %0, %1, %cst {dimension_numbers = #tpu.dot_dimension_numbers<[1], [0], [0], [1], [0, 0, 1, 1], [], []>} : vector<64x128xf32>, vector<128x128xf32>, vector<64x128xf32> -> vector<64x128xf32>
    %c0_3 = arith.constant 0 : index
    %c0_4 = arith.constant 0 : index
    %3 = vector.load %arg3[%c0_3, %c0_4] : memref<1x128xf32, #tpu.memory_space<vmem>>, vector<1x128xf32>
    %4 = vector.broadcast %3 : vector<1x128xf32> to vector<64x128xf32>
    %5 = arith.addf %2, %4 : vector<64x128xf32>
    %cst_5 = arith.constant 0.000000e+00 : f32
    %6 = vector.broadcast %cst_5 : f32 to vector<64x128xf32>
    %7 = arith.maximumf %5, %6 : vector<64x128xf32>
    %c0_6 = arith.constant 0 : index
    %c0_7 = arith.constant 0 : index
    %8 = vector.load %arg4[%c0_6, %c0_7] : memref<128x128xf32, #tpu.memory_space<vmem>>, vector<128x128xf32>
    %cst_8 = arith.constant dense<0.000000e+00> : vector<64x128xf32>
    %9 = tpu.matmul %7, %8, %cst_8 {dimension_numbers = #tpu.dot_dimension_numbers<[1], [0], [0], [1], [0, 0, 1, 1], [], []>} : vector<64x128xf32>, vector<128x128xf32>, vector<64x128xf32> -> vector<64x128xf32>
    %c0_9 = arith.constant 0 : index
    %c0_10 = arith.constant 0 : index
    %10 = vector.load %arg5[%c0_9, %c0_10] : memref<1x128xf32, #tpu.memory_space<vmem>>, vector<1x128xf32>
    %11 = vector.broadcast %10 : vector<1x128xf32> to vector<64x128xf32>
    %12 = arith.addf %9, %11 : vector<64x128xf32>
    %cst_11 = arith.constant 0.000000e+00 : f32
    %13 = vector.broadcast %cst_11 : f32 to vector<64x128xf32>
    %14 = arith.maximumf %12, %13 : vector<64x128xf32>
    %c0_12 = arith.constant 0 : index
    %c0_13 = arith.constant 0 : index
    %15 = vector.load %arg6[%c0_12, %c0_13] : memref<128x256xf32, #tpu.memory_space<vmem>>, vector<128x256xf32>
    %cst_14 = arith.constant dense<0.000000e+00> : vector<64x256xf32>
    %16 = tpu.matmul %14, %15, %cst_14 {dimension_numbers = #tpu.dot_dimension_numbers<[1], [0], [0], [1], [0, 0, 1, 1], [], []>} : vector<64x128xf32>, vector<128x256xf32>, vector<64x256xf32> -> vector<64x256xf32>
    %c0_15 = arith.constant 0 : index
    %c0_16 = arith.constant 0 : index
    %17 = vector.load %arg7[%c0_15, %c0_16] : memref<1x256xf32, #tpu.memory_space<vmem>>, vector<1x256xf32>
    %18 = vector.broadcast %17 : vector<1x256xf32> to vector<64x256xf32>
    %19 = arith.addf %16, %18 : vector<64x256xf32>
    %c0_17 = arith.constant 0 : index
    %c0_18 = arith.constant 0 : index
    %20 = vector.load %arg18[%c0_17, %c0_18] : memref<64x256xf32, #tpu.memory_space<vmem>>, vector<64x256xf32>
    tpu.vector_store %arg18[%c0_17, %c0_18], %19 {strides = array<i32>} : memref<64x256xf32, #tpu.memory_space<vmem>>, vector<64x256xf32>,
    %21 = vector.extract_strided_slice %19 {offsets = [0, 0], sizes = [64, 128], strides = [1, 1]} : vector<64x256xf32> to vector<64x128xf32>
    %22 = vector.extract_strided_slice %19 {offsets = [0, 128], sizes = [64, 128], strides = [1, 1]} : vector<64x256xf32> to vector<64x128xf32>
    %cst_19 = arith.constant 5.000000e-01 : f32
    %23 = vector.broadcast %cst_19 : f32 to vector<64x128xf32>
    %24 = arith.mulf %22, %23 : vector<64x128xf32>
    %25 = math.exp %24 : vector<64x128xf32>
    %c0_20 = arith.constant 0 : index
    %c0_21 = arith.constant 0 : index
    %c0_22 = arith.constant 0 : index
    %26 = vector.load %arg14[%c0_20, %c0_21, %c0_22] : memref<1x64x128xf32, #tpu.memory_space<vmem>>, vector<1x64x128xf32>
    %27 = vector.shape_cast %26 : vector<1x64x128xf32> to vector<64x128xf32>
    %28 = arith.mulf %25, %27 : vector<64x128xf32>
    %29 = arith.addf %21, %28 : vector<64x128xf32>
    %c0_23 = arith.constant 0 : index
    %c0_24 = arith.constant 0 : index
    %30 = vector.load %arg8[%c0_23, %c0_24] : memref<128x128xf32, #tpu.memory_space<vmem>>, vector<128x128xf32>
    %cst_25 = arith.constant dense<0.000000e+00> : vector<64x128xf32>
    %31 = tpu.matmul %29, %30, %cst_25 {dimension_numbers = #tpu.dot_dimension_numbers<[1], [0], [0], [1], [0, 0, 1, 1], [], []>} : vector<64x128xf32>, vector<128x128xf32>, vector<64x128xf32> -> vector<64x128xf32>
    %c0_26 = arith.constant 0 : index
    %c0_27 = arith.constant 0 : index
    %32 = vector.load %arg9[%c0_26, %c0_27] : memref<1x128xf32, #tpu.memory_space<vmem>>, vector<1x128xf32>
    %33 = vector.broadcast %32 : vector<1x128xf32> to vector<64x128xf32>
    %34 = arith.addf %31, %33 : vector<64x128xf32>
    %c0_28 = arith.constant 0 : index
    %c0_29 = arith.constant 0 : index
    %c0_30 = arith.constant 0 : index
    %35 = vector.load %arg15[%c0_28, %c0_29, %c0_30] : memref<1x64x128xf32, #tpu.memory_space<vmem>>, vector<1x64x128xf32>
    %36 = vector.shape_cast %35 : vector<1x64x128xf32> to vector<64x128xf32>
    %37 = arith.mulf %34, %36 : vector<64x128xf32>
    %c0_31 = arith.constant 0 : index
    %c0_32 = arith.constant 0 : index
    %38 = vector.load %arg10[%c0_31, %c0_32] : memref<128x128xf32, #tpu.memory_space<vmem>>, vector<128x128xf32>
    %cst_33 = arith.constant dense<0.000000e+00> : vector<64x128xf32>
    %39 = tpu.matmul %37, %38, %cst_33 {dimension_numbers = #tpu.dot_dimension_numbers<[1], [0], [0], [1], [0, 0, 1, 1], [], []>} : vector<64x128xf32>, vector<128x128xf32>, vector<64x128xf32> -> vector<64x128xf32>
    %c0_34 = arith.constant 0 : index
    %c0_35 = arith.constant 0 : index
    %40 = vector.load %arg11[%c0_34, %c0_35] : memref<1x128xf32, #tpu.memory_space<vmem>>, vector<1x128xf32>
    %41 = vector.broadcast %40 : vector<1x128xf32> to vector<64x128xf32>
    %42 = arith.addf %39, %41 : vector<64x128xf32>
    %c0_36 = arith.constant 0 : index
    %c0_37 = arith.constant 0 : index
    %c0_38 = arith.constant 0 : index
    %43 = vector.load %arg16[%c0_36, %c0_37, %c0_38] : memref<1x64x128xf32, #tpu.memory_space<vmem>>, vector<1x64x128xf32>
    %44 = vector.shape_cast %43 : vector<1x64x128xf32> to vector<64x128xf32>
    %45 = arith.mulf %42, %44 : vector<64x128xf32>
    %c0_39 = arith.constant 0 : index
    %c0_40 = arith.constant 0 : index
    %46 = vector.load %arg12[%c0_39, %c0_40] : memref<128x128xf32, #tpu.memory_space<vmem>>, vector<128x128xf32>
    %cst_41 = arith.constant dense<0.000000e+00> : vector<64x128xf32>
    %47 = tpu.matmul %45, %46, %cst_41 {dimension_numbers = #tpu.dot_dimension_numbers<[1], [0], [0], [1], [0, 0, 1, 1], [], []>} : vector<64x128xf32>, vector<128x128xf32>, vector<64x128xf32> -> vector<64x128xf32>
    %c0_42 = arith.constant 0 : index
    %c0_43 = arith.constant 0 : index
    %48 = vector.load %arg13[%c0_42, %c0_43] : memref<1x128xf32, #tpu.memory_space<vmem>>, vector<1x128xf32>
    %49 = vector.broadcast %48 : vector<1x128xf32> to vector<64x128xf32>
    %50 = arith.addf %47, %49 : vector<64x128xf32>
    %cst_44 = arith.constant 5.000000e-01 : f32
    %51 = vector.broadcast %cst_44 : f32 to vector<64x128xf32>
    %52 = arith.mulf %50, %51 : vector<64x128xf32>
    %53 = math.tanh %52 : vector<64x128xf32>
    %cst_45 = arith.constant 5.000000e-01 : f32
    %54 = vector.broadcast %cst_45 : f32 to vector<64x128xf32>
    %55 = arith.mulf %54, %53 : vector<64x128xf32>
    %cst_46 = arith.constant 5.000000e-01 : f32
    %56 = vector.broadcast %cst_46 : f32 to vector<64x128xf32>
    %57 = arith.addf %55, %56 : vector<64x128xf32>
    %c0_47 = arith.constant 0 : index
    %c0_48 = arith.constant 0 : index
    %c0_49 = arith.constant 0 : index
    %58 = vector.load %arg17[%c0_47, %c0_48, %c0_49] : memref<1x64x128xf32, #tpu.memory_space<vmem>>, vector<1x64x128xf32>
    %59 = vector.shape_cast %58 : vector<1x64x128xf32> to vector<64x128xf32>
    %60 = vector.shape_cast %57 : vector<64x128xf32> to vector<1x64x128xf32>
    tpu.vector_store %arg17[%c0_47, %c0_48, %c0_49], %60 {strides = array<i32>} : memref<1x64x128xf32, #tpu.memory_space<vmem>>, vector<1x64x128xf32>,
    return
  }
  func.func @transform_0(%arg0: i32) -> (i32, i32) {
    %c0_i32 = arith.constant 0 : i32
    %c0_i32_0 = arith.constant 0 : i32
    return %arg0, %c0_i32 : i32, i32
  }
  func.func @transform_1(%arg0: i32) -> (i32, i32) {
    %c0_i32 = arith.constant 0 : i32
    %c0_i32_0 = arith.constant 0 : i32
    %c0_i32_1 = arith.constant 0 : i32
    return %c0_i32, %c0_i32_0 : i32, i32
  }
  func.func @transform_2(%arg0: i32) -> (i32, i32) {
    %c0_i32 = arith.constant 0 : i32
    %c0_i32_0 = arith.constant 0 : i32
    %c0_i32_1 = arith.constant 0 : i32
    return %c0_i32, %c0_i32_0 : i32, i32
  }
  func.func @transform_3(%arg0: i32) -> (i32, i32) {
    %c0_i32 = arith.constant 0 : i32
    %c0_i32_0 = arith.constant 0 : i32
    %c0_i32_1 = arith.constant 0 : i32
    return %c0_i32, %c0_i32_0 : i32, i32
  }
  func.func @transform_4(%arg0: i32) -> (i32, i32) {
    %c0_i32 = arith.constant 0 : i32
    %c0_i32_0 = arith.constant 0 : i32
    %c0_i32_1 = arith.constant 0 : i32
    return %c0_i32, %c0_i32_0 : i32, i32
  }
  func.func @transform_5(%arg0: i32) -> (i32, i32) {
    %c0_i32 = arith.constant 0 : i32
    %c0_i32_0 = arith.constant 0 : i32
    %c0_i32_1 = arith.constant 0 : i32
    return %c0_i32, %c0_i32_0 : i32, i32
  }
  func.func @transform_6(%arg0: i32) -> (i32, i32) {
    %c0_i32 = arith.constant 0 : i32
    %c0_i32_0 = arith.constant 0 : i32
    %c0_i32_1 = arith.constant 0 : i32
    return %c0_i32, %c0_i32_0 : i32, i32
  }
  func.func @transform_7(%arg0: i32) -> (i32, i32) {
    %c0_i32 = arith.constant 0 : i32
    %c0_i32_0 = arith.constant 0 : i32
    %c0_i32_1 = arith.constant 0 : i32
    return %c0_i32, %c0_i32_0 : i32, i32
  }
  func.func @transform_8(%arg0: i32) -> (i32, i32) {
    %c0_i32 = arith.constant 0 : i32
    %c0_i32_0 = arith.constant 0 : i32
    %c0_i32_1 = arith.constant 0 : i32
    return %c0_i32, %c0_i32_0 : i32, i32
  }
  func.func @transform_9(%arg0: i32) -> (i32, i32) {
    %c0_i32 = arith.constant 0 : i32
    %c0_i32_0 = arith.constant 0 : i32
    %c0_i32_1 = arith.constant 0 : i32
    return %c0_i32, %c0_i32_0 : i32, i32
  }
  func.func @transform_10(%arg0: i32) -> (i32, i32) {
    %c0_i32 = arith.constant 0 : i32
    %c0_i32_0 = arith.constant 0 : i32
    %c0_i32_1 = arith.constant 0 : i32
    return %c0_i32, %c0_i32_0 : i32, i32
  }
  func.func @transform_11(%arg0: i32) -> (i32, i32) {
    %c0_i32 = arith.constant 0 : i32
    %c0_i32_0 = arith.constant 0 : i32
    %c0_i32_1 = arith.constant 0 : i32
    return %c0_i32, %c0_i32_0 : i32, i32
  }
  func.func @transform_12(%arg0: i32) -> (i32, i32) {
    %c0_i32 = arith.constant 0 : i32
    %c0_i32_0 = arith.constant 0 : i32
    %c0_i32_1 = arith.constant 0 : i32
    return %c0_i32, %c0_i32_0 : i32, i32
  }
  func.func @transform_13(%arg0: i32) -> (i32, i32, i32) {
    %c0_i32 = arith.constant 0 : i32
    %c0_i32_0 = arith.constant 0 : i32
    %c0_i32_1 = arith.constant 0 : i32
    return %c0_i32, %arg0, %c0_i32_0 : i32, i32, i32
  }
  func.func @transform_14(%arg0: i32) -> (i32, i32, i32) {
    %c0_i32 = arith.constant 0 : i32
    %c0_i32_0 = arith.constant 0 : i32
    %c0_i32_1 = arith.constant 0 : i32
    return %c0_i32, %arg0, %c0_i32_0 : i32, i32, i32
  }
  func.func @transform_15(%arg0: i32) -> (i32, i32, i32) {
    %c0_i32 = arith.constant 0 : i32
    %c0_i32_0 = arith.constant 0 : i32
    %c0_i32_1 = arith.constant 0 : i32
    return %c0_i32, %arg0, %c0_i32_0 : i32, i32, i32
  }
  func.func @transform_16(%arg0: i32) -> (i32, i32, i32) {
    %c0_i32 = arith.constant 0 : i32
    %c0_i32_0 = arith.constant 0 : i32
    %c0_i32_1 = arith.constant 0 : i32
    return %c0_i32, %arg0, %c0_i32_0 : i32, i32, i32
  }
  func.func @transform_17(%arg0: i32) -> (i32, i32) {
    %c0_i32 = arith.constant 0 : i32
    %c0_i32_0 = arith.constant 0 : i32
    return %arg0, %c0_i32 : i32, i32
  }
}

</mosaic_0001>

<bundles_post_ra>
// kernel: tpu_custom_call.1
= control target key start
LH: loop header
LB: loop body
LE: loop exit
PB: predicated region body
PF: predicated region fallthrough
CT: control target
= control target key end

     0   :  { %s2067_s0 = inlined_call_operand.hbm [shape: f32[64,128], index: 0, kind: input, shape index: {}]   ;;  %s2068_s1 = inlined_call_operand.hbm [shape: f32[128,128], index: 1, kind: input, shape index: {}]   ;;  %s2069_s2 = inlined_call_operand.vmem [shape: f32[1,128], index: 2, kind: input, shape index: {}]   ;;  %s2070_s3 = inlined_call_operand.hbm [shape: f32[128,128], index: 3, kind: input, shape index: {}]   ;;  %s2071_s4 = inlined_call_operand.vmem [shape: f32[1,128], index: 4, kind: input, shape index: {}]   ;;  %s2072_s5 = inlined_call_operand.hbm [shape: f32[128,256], index: 5, kind: input, shape index: {}]   ;;  %s2073_s6 = inlined_call_operand.vmem [shape: f32[1,256], index: 6, kind: input, shape index: {}]   ;;  %s2074_s7 = inlined_call_operand.hbm [shape: f32[128,128], index: 7, kind: input, shape index: {}]   ;;  %s2075_s8 = inlined_call_operand.vmem [shape: f32[1,128], index: 8, kind: input, shape index: {}]   ;;  %s2076_s9 = inlined_call_operand.hbm [shape: f32[128,128], index: 9, kind: input, shape index: {}]   ;;  %s2077_s10 = inlined_call_operand.vmem [shape: f32[1,128], index: 10, kind: input, shape index: {}]   ;;  %s2078_s11 = inlined_call_operand.hbm [shape: f32[128,128], index: 11, kind: input, shape index: {}]   ;;  %s2079_s12 = inlined_call_operand.vmem [shape: f32[1,128], index: 12, kind: input, shape index: {}]   ;;  %s2080_s13 = inlined_call_operand.hbm [shape: f32[1,64,128], index: 13, kind: input, shape index: {}]   ;;  %s2081_s14 = inlined_call_operand.hbm [shape: f32[1,64,128], index: 14, kind: input, shape index: {}]   ;;  %s2082_s15 = inlined_call_operand.hbm [shape: f32[1,64,128], index: 15, kind: input, shape index: {}]   ;;  %s2083_s16 = inlined_call_operand.hbm [shape: f32[1,64,128], index: 16, kind: output, shape index: {0}]   ;;  %s2084_s17 = inlined_call_operand.hbm [shape: f32[64,256], index: 17, kind: output, shape index: {1}]  }
   0x1   :  { %2085 = sst [smem:[#allocation30_spill]] %s2067_s0 }
   0x2   :  { %2086 = sst [smem:[#allocation31_spill]] %s2068_s1 }
   0x3   :  { %23 = vsyncpa [#allocation3], 0 }
   0x4   :  { %24 = vsyncpa [#allocation6], 0 }
   0x5   :  { %25 = vsyncpa [#allocation9], 0 }
   0x6   :  { %26 = vsyncpa [#allocation12], 0 }
   0x7   :  { %27 = vsyncpa [#allocation15], 0 }
   0x8   :  { %28 = vsyncpa [#allocation18], 0 }
   0x9   :  { %29 = vsyncpa [#allocation4], 0 }
   0xa   :  { %30 = vsyncpa [#allocation21], 0  ;;  %s1838_s24 = smov [#allocation5]   ;;  %s1839_s26 = smov [#allocation8]  }
   0xb   :  { %s48_s25 = sshll.u32 %s1838_s24, 4  ;;  %s76_s27 = sshll.u32 %s1839_s26, 4  ;;  %s49_s25 = int_to_ptr.vmem [resolvable:$true] %s48_s25  ;;  %s77_s27 = int_to_ptr.vmem [resolvable:$true] %s76_s27 }
   0xc   :  { %s1590_s28 = scalar_lea.vmem %s49_s25, 2048  ;;  %p1595_p1 = scmp.lt.s32.totalorder %s49_s25, %s49_s25 }
   0xd   :  { %p1591_p0 = scmp.ne.s32.totalorder %s49_s25, %s1590_s28  ;;  %p1596_p2 = scmp.lt.s32.totalorder %s1590_s28, %s1590_s28 }
   0xf   :  { %p1597_p3 = por %p1596_p2, %p1595_p1 }
  0x11   :  { %p1598_p4 = pnand %p1597_p3, %p1591_p0 }
  0x13   :  { %1601 = shalt.err (!%p1598_p4)
}
  0x14   :  { %s1840_s29 = smov 128   ;;  %s1841_s0 = smov 8  }
  0x15   :  { %s2087_s19 = sld [smem:[#allocation31_spill]]  ;;  %s1610_s1 = scalar_lea.vmem %s77_s27, 4096 }
  0x16   :  { %p1611_p5 = scmp.ne.s32.totalorder %s77_s27, %s1610_s1  ;;  %p1615_p6 = scmp.lt.s32.totalorder %s77_s27, %s77_s27 }
  0x17   :  { %p1616_p7 = scmp.lt.s32.totalorder %s1610_s1, %s1610_s1 }
  0x19   :  { %p1617_p8 = por %p1616_p7, %p1615_p6 }
  0x1b   :  { %54 = dma.hbm_to_vmem [thread:$0]  %s2087_s19, 2048, %s49_s25, [#allocation6], %s1840_s29, %s1840_s29, %s1841_s0  }
  0x1c   :  { %p1618_p9 = pnand %p1617_p8, %p1611_p5 }
  0x1e   :  { %1621 = shalt.err (!%p1618_p9)
}
  0x1f   :  { %s1842_s20 = smov 256   ;;  %s1843_s21 = smov 16  }
  0x20   :  { %82 = dma.hbm_to_vmem [thread:$0]  %s2072_s5, 4096, %s77_s27, [#allocation9], %s1842_s20, %s1842_s20, %s1843_s21  }
  0x21   :  { %s1844_s24 = smov [#allocation11]   ;;  %s1845_s28 = smov [#allocation14]  }
  0x22   :  { %s104_s26 = sshll.u32 %s1844_s24, 4  ;;  %s132_s25 = sshll.u32 %s1845_s28, 4  ;;  %s105_s26 = int_to_ptr.vmem [resolvable:$true] %s104_s26  ;;  %s133_s25 = int_to_ptr.vmem [resolvable:$true] %s132_s25 }
  0x23   :  { %s1630_s30 = scalar_lea.vmem %s105_s26, 2048  ;;  %p1635_p11 = scmp.lt.s32.totalorder %s105_s26, %s105_s26 }
  0x24   :  { %p1631_p10 = scmp.ne.s32.totalorder %s105_s26, %s1630_s30  ;;  %p1636_p12 = scmp.lt.s32.totalorder %s1630_s30, %s1630_s30 }
  0x26   :  { %p1637_p13 = por %p1636_p12, %p1635_p11 }
  0x28   :  { %p1638_p0 = pnand %p1637_p13, %p1631_p10 }
  0x2a   :  { %1641 = shalt.err (!%p1638_p0)
}
  0x2b   :  { %110 = dma.hbm_to_vmem [thread:$0]  %s2076_s9, 2048, %s105_s26, [#allocation12], %s1840_s29, %s1840_s29, %s1841_s0  }
  0x2c   :  { %s1650_s5 = scalar_lea.vmem %s133_s25, 1024  ;;  %p1655_p2 = scmp.lt.s32.totalorder %s133_s25, %s133_s25 }
  0x2d   :  { %p1651_p1 = scmp.ne.s32.totalorder %s133_s25, %s1650_s5  ;;  %p1656_p3 = scmp.lt.s32.totalorder %s1650_s5, %s1650_s5 }
  0x2f   :  { %p1657_p4 = por %p1656_p3, %p1655_p2 }
  0x31   :  { %p1658_p5 = pnand %p1657_p4, %p1651_p1 }
  0x33   :  { %1661 = shalt.err (!%p1658_p5)
}
  0x34   :  { %138 = dma.hbm_to_vmem [thread:$0]  %s2080_s13, 1024, %s133_s25, [#allocation15], %s1840_s29, %s1840_s29, %s1841_s0  }
  0x35   :  { %s1846_s22 = smov [#allocation2]   ;;  %s1847_s24 = smov [#allocation7]  }
  0x36   :  { %s36_s23 = sshll.u32 %s1846_s22, 4  ;;  %s62_s28 = sshll.u32 %s1847_s24, 4  ;;  %s37_s23 = int_to_ptr.vmem [resolvable:$true] %s36_s23  ;;  %s63_s28 = int_to_ptr.vmem [resolvable:$true] %s62_s28 }
  0x37   :  { %s1670_s9 = scalar_lea.vmem %s37_s23, 1024  ;;  %p1675_p7 = scmp.lt.s32.totalorder %s37_s23, %s37_s23 }
  0x38   :  { %p1671_p6 = scmp.ne.s32.totalorder %s37_s23, %s1670_s9  ;;  %p1676_p8 = scmp.lt.s32.totalorder %s1670_s9, %s1670_s9 }
  0x3a   :  { %p1677_p9 = por %p1676_p8, %p1675_p7 }
  0x3c   :  { %p1678_p10 = pnand %p1677_p9, %p1671_p6 }
  0x3e   :  { %1681 = shalt.err (!%p1678_p10)
}
  0x3f   :  { %s2088_s18 = sld [smem:[#allocation30_spill]]  ;;  %s1690_s13 = scalar_lea.vmem %s63_s28, 2048 }
  0x40   :  { %p1691_p11 = scmp.ne.s32.totalorder %s63_s28, %s1690_s13  ;;  %p1695_p12 = scmp.lt.s32.totalorder %s63_s28, %s63_s28 }
  0x41   :  { %p1696_p13 = scmp.lt.s32.totalorder %s1690_s13, %s1690_s13 }
  0x43   :  { %p1697_p0 = por %p1696_p13, %p1695_p12 }
  0x45   :  { %42 = dma.hbm_to_vmem [thread:$0]  %s2088_s18, 1024, %s37_s23, [#allocation3], %s1840_s29, %s1840_s29, %s1841_s0  }
  0x46   :  { %p1698_p1 = pnand %p1697_p0, %p1691_p11 }
  0x48   :  { %1701 = shalt.err (!%p1698_p1)
}
  0x49   :  { %68 = dma.hbm_to_vmem [thread:$0]  %s2070_s3, 2048, %s63_s28, [#allocation6], %s1840_s29, %s1840_s29, %s1841_s0  }
  0x4a   :  { %s1848_s5 = smov [#allocation10]   ;;  %s1849_s1 = smov [#allocation13]  }
  0x4b   :  { %s90_s27 = sshll.u32 %s1848_s5, 4  ;;  %s118_s22 = sshll.u32 %s1849_s1, 4  ;;  %s91_s27 = int_to_ptr.vmem [resolvable:$true] %s90_s27  ;;  %s119_s22 = int_to_ptr.vmem [resolvable:$true] %s118_s22 }
  0x4c   :  { %s1710_s23 = scalar_lea.vmem %s91_s27, 2048  ;;  %p1715_p3 = scmp.lt.s32.totalorder %s91_s27, %s91_s27 }
  0x4d   :  { %p1711_p2 = scmp.ne.s32.totalorder %s91_s27, %s1710_s23  ;;  %p1716_p4 = scmp.lt.s32.totalorder %s1710_s23, %s1710_s23 }
  0x4f   :  { %p1717_p5 = por %p1716_p4, %p1715_p3 }
  0x51   :  { %p1718_p6 = pnand %p1717_p5, %p1711_p2 }
  0x53   :  { %1721 = shalt.err (!%p1718_p6)
}
  0x54   :  { %96 = dma.hbm_to_vmem [thread:$0]  %s2074_s7, 2048, %s91_s27, [#allocation9], %s1840_s29, %s1840_s29, %s1841_s0  }
  0x55   :  { %s1730_s3 = scalar_lea.vmem %s119_s22, 2048  ;;  %p1735_p8 = scmp.lt.s32.totalorder %s119_s22, %s119_s22 }
  0x56   :  { %p1731_p7 = scmp.ne.s32.totalorder %s119_s22, %s1730_s3  ;;  %p1736_p9 = scmp.lt.s32.totalorder %s1730_s3, %s1730_s3 }
  0x58   :  { %p1737_p10 = por %p1736_p9, %p1735_p8 }
  0x5a   :  { %p1738_p11 = pnand %p1737_p10, %p1731_p7 }
  0x5c   :  { %1741 = shalt.err (!%p1738_p11)
}
  0x5d   :  { %124 = dma.hbm_to_vmem [thread:$0]  %s2078_s11, 2048, %s119_s22, [#allocation12], %s1840_s29, %s1840_s29, %s1841_s0  }
  0x5e   :  { %s1850_s30 = smov [#allocation16]   ;;  %s1851_s13 = smov [#allocation17]  }
  0x5f   :  { %s144_s18 = sshll.u32 %s1850_s30, 4  ;;  %s156_s25 = sshll.u32 %s1851_s13, 4  ;;  %s145_s18 = int_to_ptr.vmem [resolvable:$true] %s144_s18  ;;  %s157_s25 = int_to_ptr.vmem [resolvable:$true] %s156_s25 }
  0x60   :  { %s1750_s7 = scalar_lea.vmem %s145_s18, 1024  ;;  %p1755_p13 = scmp.lt.s32.totalorder %s145_s18, %s145_s18 }
  0x61   :  { %p1751_p12 = scmp.ne.s32.totalorder %s145_s18, %s1750_s7  ;;  %p1756_p0 = scmp.lt.s32.totalorder %s1750_s7, %s1750_s7 }
  0x63   :  { %p1757_p1 = por %p1756_p0, %p1755_p13 }
  0x65   :  { %p1758_p2 = pnand %p1757_p1, %p1751_p12 }
  0x67   :  { %1761 = shalt.err (!%p1758_p2)
}
  0x68   :  { %150 = dma.hbm_to_vmem [thread:$0]  %s2081_s14, 1024, %s145_s18, [#allocation15], %s1840_s29, %s1840_s29, %s1841_s0  }
  0x69   :  { %s1770_s11 = scalar_lea.vmem %s157_s25, 1024  ;;  %p1775_p4 = scmp.lt.s32.totalorder %s157_s25, %s157_s25 }
  0x6a   :  { %p1771_p3 = scmp.ne.s32.totalorder %s157_s25, %s1770_s11  ;;  %p1776_p5 = scmp.lt.s32.totalorder %s1770_s11, %s1770_s11 }
  0x6c   :  { %p1777_p6 = por %p1776_p5, %p1775_p4 }
  0x6e   :  { %p1778_p7 = pnand %p1777_p6, %p1771_p3 }
  0x70   :  { %1781 = shalt.err (!%p1778_p7)
}
  0x71   :  { %162 = dma.hbm_to_vmem [thread:$0]  %s2082_s15, 1024, %s157_s25, [#allocation18], %s1840_s29, %s1840_s29, %s1841_s0  }
  0x72   :  { %1822 = dma.done.wait [#allocation3], 1024  }
  0x73   :  { %1823 = vsyncadd [#allocation3], 4294966272 }
  0x74   :  { %1824 = dma.done.wait [#allocation6], 4096  }
  0x75   :  { %1825 = vsyncadd [#allocation6], 4294963200 }
  0x76   :  { %1826 = dma.done.wait [#allocation9], 6144  }
  0x77   :  { %1827 = vsyncadd [#allocation9], 4294961152 }
  0x78   :  { %1828 = dma.done.wait [#allocation12], 4096  }
  0x79   :  { %1829 = vsyncadd [#allocation12], 4294963200 }
  0x7a   :  { %1830 = dma.done.wait [#allocation15], 2048  }
  0x7b   :  { %1831 = vsyncadd [#allocation15], 4294965248 }
  0x7c   :  { %1832 = dma.done.wait [#allocation18], 1024  }
  0x7d   :  { %1833 = vsyncadd [#allocation18], 4294966272  ;;  %v216_v0 = vld [vmem:[#allocation5 + $0x78] sm:$0xff]  ;;  %v215_v1 = vld [vmem:[#allocation5 + $0x70] sm:$0xff] }
  0x7e   :  { %1313 = vmatprep.subr.mxu0 %v216_v0  ;;  %v214_v2 = vld [vmem:[#allocation5 + $0x68] sm:$0xff]  ;;  %v213_v3 = vld [vmem:[#allocation5 + $0x60] sm:$0xff]  ;;  %v212_v5 = vld [vmem:[#allocation5 + $0x58] sm:$0xff] }
  0x7f   :  { %1314 = vmatpush3.msra.mxu0 %v216_v0  ;;  %v193_v4 = vld [vmem:[#allocation2] sm:$0xff]  ;;  %v211_v6 = vld [vmem:[#allocation5 + $0x50] sm:$0xff]  ;;  %v352_v7 = vld [vmem:[#allocation7 + $0x78] sm:$0xff] }
  0x80   :  { %1315 = vmatprep.subr.mxu0 %v215_v1  ;;  %1345 = vmatprep.mubr.f32.mxu0 %v193_v4  ;;  %v351_v8 = vld [vmem:[#allocation7 + $0x70] sm:$0xff]  ;;  %v210_v9 = vld [vmem:[#allocation5 + $0x48] sm:$0xff]  ;;  %v209_v11 = vld [vmem:[#allocation5 + $0x40] sm:$0xff] }
  0x81   :  { %1316 = vmatpush3.msra.mxu0 %v215_v1  ;;  %1357 = vmatprep.subr.mxu1 %v352_v7  ;;  %v350_v10 = vld [vmem:[#allocation7 + $0x68] sm:$0xff]  ;;  %v349_v12 = vld [vmem:[#allocation7 + $0x60] sm:$0xff]  ;;  %v208_v13 = vld [vmem:[#allocation5 + $0x38] sm:$0xff] }
  0x82   :  { %1317 = vmatprep.subr.mxu0 %v214_v2  ;;  %1358 = vmatpush3.msra.mxu1 %v352_v7  ;;  %v348_v14 = vld [vmem:[#allocation7 + $0x58] sm:$0xff]  ;;  %v207_v15 = vld [vmem:[#allocation5 + $0x30] sm:$0xff]  ;;  %v206_v17 = vld [vmem:[#allocation5 + $0x28] sm:$0xff] }
  0x83   :  { %1318 = vmatpush3.msra.mxu0 %v214_v2  ;;  %1359 = vmatprep.subr.mxu1 %v351_v8  ;;  %v347_v16 = vld [vmem:[#allocation7 + $0x50] sm:$0xff]  ;;  %v346_v18 = vld [vmem:[#allocation7 + $0x48] sm:$0xff]  ;;  %v205_v19 = vld [vmem:[#allocation5 + $0x20] sm:$0xff] }
  0x84   :  { %1319 = vmatprep.subr.mxu0 %v213_v3  ;;  %1360 = vmatpush3.msra.mxu1 %v351_v8  ;;  %v345_v20 = vld [vmem:[#allocation7 + $0x40] sm:$0xff]  ;;  %v204_v21 = vld [vmem:[#allocation5 + $0x18] sm:$0xff]  ;;  %v203_v23 = vld [vmem:[#allocation5 + $0x10] sm:$0xff] }
  0x85   :  { %1320 = vmatpush3.msra.mxu0 %v213_v3  ;;  %1361 = vmatprep.subr.mxu1 %v350_v10  ;;  %v344_v22 = vld [vmem:[#allocation7 + $0x38] sm:$0xff]  ;;  %v343_v24 = vld [vmem:[#allocation7 + $0x30] sm:$0xff]  ;;  %v202_v25 = vld [vmem:[#allocation5 + $0x8] sm:$0xff] }
  0x86   :  { %1321 = vmatprep.subr.mxu0 %v212_v5  ;;  %1362 = vmatpush3.msra.mxu1 %v350_v10  ;;  %v342_v26 = vld [vmem:[#allocation7 + $0x28] sm:$0xff]  ;;  %v201_v27 = vld [vmem:[#allocation5] sm:$0xff]  ;;  %v195_v30 = vld [vmem:[#allocation2 + $0x10] sm:$0xff] }
  0x87   :  { %1322 = vmatpush3.msra.mxu0 %v212_v5  ;;  %1363 = vmatprep.subr.mxu1 %v349_v12  ;;  %v341_v28 = vld [vmem:[#allocation7 + $0x20] sm:$0xff]  ;;  %v194_v29 = vld [vmem:[#allocation2 + $0x8] sm:$0xff]  ;;  %v196_v31 = vld [vmem:[#allocation2 + $0x18] sm:$0xff] }
  0x88   :  { %1323 = vmatprep.subr.mxu0 %v211_v6  ;;  %1364 = vmatpush3.msra.mxu1 %v349_v12  ;;  %v197_v32 = vld [vmem:[#allocation2 + $0x20] sm:$0xff]  ;;  %v198_v33 = vld [vmem:[#allocation2 + $0x28] sm:$0xff]  ;;  %v199_v34 = vld [vmem:[#allocation2 + $0x30] sm:$0xff] }
  0x89   :  { %1324 = vmatpush3.msra.mxu0 %v211_v6  ;;  %1365 = vmatprep.subr.mxu1 %v348_v14  ;;  %v200_v35 = vld [vmem:[#allocation2 + $0x38] sm:$0xff]  ;;  %v339_v37 = vld [vmem:[#allocation7 + $0x10] sm:$0xff]  ;;  %v338_v38 = vld [vmem:[#allocation7 + $0x8] sm:$0xff] }
  0x8a   :  { %1325 = vmatprep.subr.mxu0 %v210_v9  ;;  %1366 = vmatpush3.msra.mxu1 %v348_v14  ;;  %v340_v36 = vld [vmem:[#allocation7 + $0x18] sm:$0xff]  ;;  %v337_v39 = vld [vmem:[#allocation7] sm:$0xff]  ;;  %v503_v41 = vld [vmem:[#allocation8 + $0xf0] sm:$0xff] }
  0x8b   :  { %1326 = vmatpush3.msra.mxu0 %v210_v9  ;;  %1367 = vmatprep.subr.mxu1 %v347_v16  ;;  %v504_v40 = vld [vmem:[#allocation8 + $0xf8] sm:$0xff]  ;;  %v502_v42 = vld [vmem:[#allocation8 + $0xe8] sm:$0xff]  ;;  %v501_v43 = vld [vmem:[#allocation8 + $0xe0] sm:$0xff] }
  0x8c   :  { %1327 = vmatprep.subr.mxu0 %v209_v11  ;;  %1368 = vmatpush3.msra.mxu1 %v347_v16  ;;  %v500_v44 = vld [vmem:[#allocation8 + $0xd8] sm:$0xff]  ;;  %v499_v45 = vld [vmem:[#allocation8 + $0xd0] sm:$0xff]  ;;  %v498_v46 = vld [vmem:[#allocation8 + $0xc8] sm:$0xff] }
  0x8d   :  { %1328 = vmatpush3.msra.mxu0 %v209_v11  ;;  %1369 = vmatprep.subr.mxu1 %v346_v18  ;;  %v497_v47 = vld [vmem:[#allocation8 + $0xc0] sm:$0xff]  ;;  %v496_v48 = vld [vmem:[#allocation8 + $0xb8] sm:$0xff]  ;;  %v495_v49 = vld [vmem:[#allocation8 + $0xb0] sm:$0xff] }
  0x8e   :  { %1329 = vmatprep.subr.mxu0 %v208_v13  ;;  %1370 = vmatpush3.msra.mxu1 %v346_v18  ;;  %v494_v50 = vld [vmem:[#allocation8 + $0xa8] sm:$0xff]  ;;  %v493_v51 = vld [vmem:[#allocation8 + $0xa0] sm:$0xff]  ;;  %v492_v52 = vld [vmem:[#allocation8 + $0x98] sm:$0xff] }
  0x8f   :  { %1330 = vmatpush3.msra.mxu0 %v208_v13  ;;  %1371 = vmatprep.subr.mxu1 %v345_v20  ;;  %v491_v53 = vld [vmem:[#allocation8 + $0x90] sm:$0xff]  ;;  %v490_v54 = vld [vmem:[#allocation8 + $0x88] sm:$0xff]  ;;  %v489_v55 = vld [vmem:[#allocation8 + $0x80] sm:$0xff] }
  0x90   :  { %1331 = vmatprep.subr.mxu0 %v207_v15  ;;  %1372 = vmatpush3.msra.mxu1 %v345_v20  ;;  %v488_v56 = vld [vmem:[#allocation8 + $0x78] sm:$0xff]  ;;  %v487_v57 = vld [vmem:[#allocation8 + $0x70] sm:$0xff]  ;;  %v486_v58 = vld [vmem:[#allocation8 + $0x68] sm:$0xff] }
  0x91   :  { %1332 = vmatpush3.msra.mxu0 %v207_v15  ;;  %1373 = vmatprep.subr.mxu1 %v344_v22  ;;  %v485_v59 = vld [vmem:[#allocation8 + $0x60] sm:$0xff]  ;;  %v484_v60 = vld [vmem:[#allocation8 + $0x58] sm:$0xff]  ;;  %v483_v61 = vld [vmem:[#allocation8 + $0x50] sm:$0xff] }
  0x92   :  { %1333 = vmatprep.subr.mxu0 %v206_v17  ;;  %1374 = vmatpush3.msra.mxu1 %v344_v22  ;;  %v482_v62 = vld [vmem:[#allocation8 + $0x48] sm:$0xff]  ;;  %v481_v63 = vld [vmem:[#allocation8 + $0x40] sm:$0xff]  ;;  %v480_v0 = vld [vmem:[#allocation8 + $0x38] sm:$0xff] }
  0x93   :  { %1334 = vmatpush3.msra.mxu0 %v206_v17  ;;  %1375 = vmatprep.subr.mxu1 %v343_v24  ;;  %v1188_v1 = vld [vmem:[%s2069_s2] ss:$0 sm:$0xff] }
  0x94   :  { %1335 = vmatprep.subr.mxu0 %v205_v19  ;;  %1376 = vmatpush3.msra.mxu1 %v343_v24 }
  0x95   :  { %1336 = vmatpush3.msra.mxu0 %v205_v19  ;;  %1377 = vmatprep.subr.mxu1 %v342_v26 }
  0x96   :  { %1337 = vmatprep.subr.mxu0 %v204_v21  ;;  %1378 = vmatpush3.msra.mxu1 %v342_v26  ;;  %v479_v26 = vld [vmem:[#allocation8 + $0x30] sm:$0xff] }
  0x97   :  { %1338 = vmatpush3.msra.mxu0 %v204_v21  ;;  %1379 = vmatprep.subr.mxu1 %v341_v28 }
  0x98   :  { %1339 = vmatprep.subr.mxu0 %v203_v23  ;;  %1380 = vmatpush3.msra.mxu1 %v341_v28  ;;  %v477_v28 = vld [vmem:[#allocation8 + $0x20] sm:$0xff] }
  0x99   :  { %1340 = vmatpush3.msra.mxu0 %v203_v23  ;;  %1381 = vmatprep.subr.mxu1 %v340_v36 }
  0x9a   :  { %1341 = vmatprep.subr.mxu0 %v202_v25  ;;  %1382 = vmatpush3.msra.mxu1 %v340_v36  ;;  %v1189_v36 = vld [vmem:[%s2071_s4] ss:$0 sm:$0xff] }
  0x9b   :  { %1342 = vmatpush3.msra.mxu0 %v202_v25  ;;  %1383 = vmatprep.subr.mxu1 %v339_v37 }
  0x9c   :  { %1343 = vmatprep.subr.mxu0 %v201_v27  ;;  %1384 = vmatpush3.msra.mxu1 %v339_v37 }
  0x9d   :  { %1344 = vmatpush3.msra.mxu0 %v201_v27  ;;  %1385 = vmatprep.subr.mxu1 %v338_v38  ;;  %v478_v27 = vld [vmem:[#allocation8 + $0x28] sm:$0xff] }
  0x9e   :  { %1346 = vmatmul.mubr.f32.vlgmr.msra.gmra.mxu0 %v194_v29  ;;  %1386 = vmatpush3.msra.mxu1 %v338_v38  ;;  %v476_v29 = vld [vmem:[#allocation8 + $0x18] sm:$0xff] }
  0x9f   :  { %1348 = vmatprep.mubr.f32.mxu0 %v195_v30  ;;  %1387 = vmatprep.subr.mxu1 %v337_v39  ;;  %v475_v30 = vld [vmem:[#allocation8 + $0x10] sm:$0xff] }
  0xa0   :  { %1388 = vmatpush3.msra.mxu1 %v337_v39  ;;  %517 = vmatprep.subr.mxu0 %v504_v40 }
  0xa1   :  { %518 = vmatpush1.msra.mxu0 %v503_v41 }
  0xa2   :  { %1349 = vmatmul.mubr.f32.gmra.mxu0 %v196_v31  ;;  %519 = vmatprep.subr.mxu0 %v502_v42  ;;  %v474_v31 = vld [vmem:[#allocation8 + $0x8] sm:$0xff] }
  0xa3   :  { %1351 = vmatprep.mubr.f32.mxu0 %v197_v32  ;;  %520 = vmatpush1.msra.mxu0 %v501_v43  ;;  %v473_v32 = vld [vmem:[#allocation8] sm:$0xff] }
  0xa4   :  { %521 = vmatprep.subr.mxu0 %v500_v44 }
  0xa5   :  { %522 = vmatpush1.msra.mxu0 %v499_v45 }
  0xa6   :  { %1352 = vmatmul.mubr.f32.gmra.mxu0 %v198_v33  ;;  %523 = vmatprep.subr.mxu0 %v498_v46  ;;  %v1852_v33 = vmov 0.0  }
  0xa7   :  { %1354 = vmatprep.mubr.f32.mxu0 %v199_v34  ;;  %524 = vmatpush1.msra.mxu0 %v497_v47  ;;  %v709_v34 = vld [vmem:[#allocation10 + $0x78] sm:$0xff] }
  0xa8   :  { %525 = vmatprep.subr.mxu0 %v496_v48  ;;  %1401 = vmatprep.subr.mxu1 %v709_v34 }
  0xa9   :  { %526 = vmatpush1.msra.mxu0 %v495_v49 }
  0xaa   :  { %1355 = vmatmul.mubr.f32.gmra.mxu0 %v200_v35  ;;  %527 = vmatprep.subr.mxu0 %v494_v50 }
  0xab   :  { %528 = vmatpush1.msra.mxu0 %v493_v51  ;;  %581 = vmatprep.mubr.f32.mxu0 %v1852_v33 }
  0xac   :  { %529 = vmatprep.subr.mxu0 %v492_v52 }
  0xad   :  { %530 = vmatpush1.msra.mxu0 %v491_v53 }
  0xae   :  { %531 = vmatprep.subr.mxu0 %v490_v54 }
  0xaf   :  { %532 = vmatpush1.msra.mxu0 %v489_v55 }
  0xb0   :  { %533 = vmatprep.subr.mxu0 %v488_v56 }
  0xb1   :  { %534 = vmatpush1.msra.mxu0 %v487_v57 }
  0xb2   :  { %535 = vmatprep.subr.mxu0 %v486_v58 }
  0xb3   :  { %536 = vmatpush1.msra.mxu0 %v485_v59 }
  0xb4   :  { %537 = vmatprep.subr.mxu0 %v484_v60  ;;  %v708_v60 = vld [vmem:[#allocation10 + $0x70] sm:$0xff] }
  0xb5   :  { %538 = vmatpush1.msra.mxu0 %v483_v61  ;;  %v707_v61 = vld [vmem:[#allocation10 + $0x68] sm:$0xff] }
  0xb6   :  { %539 = vmatprep.subr.mxu0 %v482_v62  ;;  %v706_v62 = vld [vmem:[#allocation10 + $0x60] sm:$0xff] }
  0xb7   :  { %540 = vmatpush1.msra.mxu0 %v481_v63  ;;  %v705_v63 = vld [vmem:[#allocation10 + $0x58] sm:$0xff] }
  0xb8   :  { %541 = vmatprep.subr.mxu0 %v480_v0  ;;  %v704_v0 = vld [vmem:[#allocation10 + $0x50] sm:$0xff] }
  0xb9   :  { %542 = vmatpush1.msra.mxu0 %v479_v26  ;;  %v505_v26 = vld [vmem:[%s2073_s6] sm:$0x3] }
  0xba   :  { %543 = vmatprep.subr.mxu0 %v478_v27 }
  0xbb   :  { %544 = vmatpush1.msra.mxu0 %v477_v28 }
  0xbc   :  { %545 = vmatprep.subr.mxu0 %v476_v29 }
  0xbd   :  { %546 = vmatpush1.msra.mxu0 %v475_v30 }
  0xbe   :  { %547 = vmatprep.subr.mxu0 %v474_v31 }
  0xbf   :  { %548 = vmatpush1.msra.mxu0 %v473_v32 }
 0x15e   :  { %v1347_v2 = vpop.f32.mrf.mxu0 }
 0x15f   :  { %v296_v3 = vadd.f32 %v1347_v2, %v1188_v1  ;;  %v702_v2 = vld [vmem:[#allocation10 + $0x40] sm:$0xff] }
 0x160   :  { %v290_v4 = vpop.f32.mrf.mxu0 }
 0x161   :  { %v291_v5 = vadd.f32 %v1188_v1, %v290_v4  ;;  %v330_v9 = vmax.f32 %v296_v3, 0.0  ;;  %v701_v3 = vld [vmem:[#allocation10 + $0x38] sm:$0xff]  ;;  %v700_v4 = vld [vmem:[#allocation10 + $0x30] sm:$0xff] }
 0x162   :  { %v1350_v6 = vpop.f32.mrf.mxu0 }
 0x163   :  { %v306_v7 = vadd.f32 %v1350_v6, %v1188_v1  ;;  %v329_v8 = vmax.f32 %v291_v5, 0.0  ;;  %v699_v5 = vld [vmem:[#allocation10 + $0x28] sm:$0xff]  ;;  %v698_v6 = vld [vmem:[#allocation10 + $0x20] sm:$0xff] }
 0x164   :  { %v300_v10 = vpop.f32.mrf.mxu0 }
 0x165   :  { %v301_v11 = vadd.f32 %v1188_v1, %v300_v10  ;;  %1389 = vmatprep.mubr.f32.mxu1 %v329_v8  ;;  %v332_v12 = vmax.f32 %v306_v7, 0.0  ;;  %v697_v7 = vld [vmem:[#allocation10 + $0x18] sm:$0xff]  ;;  %v696_v8 = vld [vmem:[#allocation10 + $0x10] sm:$0xff]  ;;  %v694_v10 = vld [vmem:[#allocation10] sm:$0xff] }
 0x166   :  { %1390 = vmatmul.mubr.f32.vlgmr.msra.gmra.mxu1 %v330_v9  ;;  %v1353_v13 = vpop.f32.mrf.mxu0  ;;  %v695_v9 = vld [vmem:[#allocation10 + $0x8] sm:$0xff] }
 0x167   :  { %v331_v14 = vmax.f32 %v301_v11, 0.0  ;;  %v316_v15 = vadd.f32 %v1353_v13, %v1188_v1  ;;  %1402 = vmatpush3.msra.mxu1 %v709_v34  ;;  %v853_v11 = vld [vmem:[#allocation11 + $0x78] sm:$0xff]  ;;  %v851_v13 = vld [vmem:[#allocation11 + $0x68] sm:$0xff] }
 0x168   :  { %v310_v16 = vpop.f32.mrf.mxu0  ;;  %1403 = vmatprep.subr.mxu1 %v708_v60  ;;  %1445 = vmatprep.subr.mxu0 %v853_v11 }
 0x169   :  { %1392 = vmatprep.mubr.f32.mxu1 %v331_v14  ;;  %v311_v17 = vadd.f32 %v1188_v1, %v310_v16  ;;  %v334_v18 = vmax.f32 %v316_v15, 0.0  ;;  %1404 = vmatpush3.msra.mxu1 %v708_v60  ;;  %v850_v14 = vld [vmem:[#allocation11 + $0x60] sm:$0xff]  ;;  %v849_v15 = vld [vmem:[#allocation11 + $0x58] sm:$0xff]  ;;  %v848_v16 = vld [vmem:[#allocation11 + $0x50] sm:$0xff] }
 0x16a   :  { %1393 = vmatmul.mubr.f32.gmra.mxu1 %v332_v12  ;;  %v1356_v19 = vpop.f32.mrf.mxu0  ;;  %1405 = vmatprep.subr.mxu1 %v707_v61  ;;  %v852_v12 = vld [vmem:[#allocation11 + $0x70] sm:$0xff] }
 0x16b   :  { %v333_v20 = vmax.f32 %v311_v17, 0.0  ;;  %v326_v21 = vadd.f32 %v1356_v19, %v1188_v1  ;;  %1406 = vmatpush3.msra.mxu1 %v707_v61  ;;  %v847_v17 = vld [vmem:[#allocation11 + $0x48] sm:$0xff]  ;;  %v845_v19 = vld [vmem:[#allocation11 + $0x38] sm:$0xff] }
 0x16c   :  { %v320_v22 = vpop.f32.mrf.mxu0  ;;  %1407 = vmatprep.subr.mxu1 %v706_v62 }
 0x16d   :  { %1395 = vmatprep.mubr.f32.mxu1 %v333_v20  ;;  %v321_v23 = vadd.f32 %v1188_v1, %v320_v22  ;;  %v336_v24 = vmax.f32 %v326_v21, 0.0  ;;  %1408 = vmatpush3.msra.mxu1 %v706_v62  ;;  %v703_v1 = vld [vmem:[#allocation10 + $0x48] sm:$0xff]  ;;  %v844_v20 = vld [vmem:[#allocation11 + $0x30] sm:$0xff]  ;;  %v842_v22 = vld [vmem:[#allocation11 + $0x20] sm:$0xff] }
 0x16e   :  { %1396 = vmatmul.mubr.f32.gmra.mxu1 %v334_v18  ;;  %1409 = vmatprep.subr.mxu1 %v705_v63  ;;  %v846_v18 = vld [vmem:[#allocation11 + $0x40] sm:$0xff]  ;;  %v843_v21 = vld [vmem:[#allocation11 + $0x28] sm:$0xff] }
 0x16f   :  { %v335_v25 = vmax.f32 %v321_v23, 0.0  ;;  %1410 = vmatpush3.msra.mxu1 %v705_v63  ;;  %v507_v23 = vlaneseq }
 0x170   :  { %1411 = vmatprep.subr.mxu1 %v704_v0 }
 0x171   :  { %1398 = vmatprep.mubr.f32.mxu1 %v335_v25  ;;  %1412 = vmatpush3.msra.mxu1 %v704_v0 }
 0x172   :  { %1399 = vmatmul.mubr.f32.gmra.mxu1 %v336_v24  ;;  %1413 = vmatprep.subr.mxu1 %v703_v1  ;;  %v508_v24 = vshrl.u32 %v507_v23, 7  ;;  %v673_v23 = vld [vmem:[#allocation14 + $0x18] sm:$0xff] }
 0x173   :  { %1414 = vmatpush3.msra.mxu1 %v703_v1 }
 0x174   :  { %1415 = vmatprep.subr.mxu1 %v702_v2  ;;  %v509_v25 = vsub.s32 0, %v508_v24  ;;  %v513_v27 = vsub.s32 1, %v508_v24 }
 0x175   :  { %1416 = vmatpush3.msra.mxu1 %v702_v2 }
 0x176   :  { %1417 = vmatprep.subr.mxu1 %v701_v3  ;;  %v2014_v28 = vrot.slane %v505_v26, %v509_v25  ;;  %v2016_v29 = vrot.slane %v505_v26, %v513_v27 }
 0x177   :  { %1418 = vmatpush3.msra.mxu1 %v701_v3 }
 0x178   :  { %1419 = vmatprep.subr.mxu1 %v700_v4 }
 0x179   :  { %1420 = vmatpush3.msra.mxu1 %v700_v4  ;;  %v671_v4 = vld [vmem:[#allocation14 + $0x8] sm:$0xff] }
 0x17a   :  { %1421 = vmatprep.subr.mxu1 %v699_v5 }
 0x17b   :  { %1422 = vmatpush3.msra.mxu1 %v699_v5 }
 0x17c   :  { %1423 = vmatprep.subr.mxu1 %v698_v6 }
 0x17d   :  { %1424 = vmatpush3.msra.mxu1 %v698_v6 }
 0x17e   :  { %1425 = vmatprep.subr.mxu1 %v697_v7 }
 0x17f   :  { %1426 = vmatpush3.msra.mxu1 %v697_v7 }
 0x180   :  { %1427 = vmatprep.subr.mxu1 %v696_v8 }
 0x181   :  { %1428 = vmatpush3.msra.mxu1 %v696_v8 }
 0x182   :  { %1429 = vmatprep.subr.mxu1 %v695_v9 }
 0x183   :  { %1430 = vmatpush3.msra.mxu1 %v695_v9 }
 0x184   :  { %1431 = vmatprep.subr.mxu1 %v694_v10 }
 0x185   :  { %1432 = vmatpush3.msra.mxu1 %v694_v10 }
 0x226   :  { %v1391_v35 = vpop.f32.mrf.mxu1 }
 0x227   :  { %v432_v40 = vadd.f32 %v1391_v35, %v1189_v36 }
 0x228   :  { %v426_v37 = vpop.f32.mrf.mxu1 }
 0x229   :  { %v427_v38 = vadd.f32 %v1189_v36, %v426_v37  ;;  %v466_v43 = vmax.f32 %v432_v40, 0.0 }
 0x22a   :  { %v1394_v39 = vpop.f32.mrf.mxu1 }
 0x22b   :  { %v465_v41 = vmax.f32 %v427_v38, 0.0  ;;  %v442_v46 = vadd.f32 %v1394_v39, %v1189_v36 }
 0x22c   :  { %v436_v42 = vpop.f32.mrf.mxu1 }
 0x22d   :  { %582 = vmatmul.mubr.f32.vlgmr.msra.gmra.mxu0 %v465_v41  ;;  %v437_v44 = vadd.f32 %v1189_v36, %v436_v42  ;;  %v468_v49 = vmax.f32 %v442_v46, 0.0 }
 0x22e   :  { %587 = vmatprep.mubr.f32.mxu0 %v1852_v33  ;;  %v1397_v45 = vpop.f32.mrf.mxu1  ;;  %1446 = vmatpush3.msra.mxu0 %v853_v11 }
 0x22f   :  { %v467_v47 = vmax.f32 %v437_v44, 0.0  ;;  %v452_v52 = vadd.f32 %v1397_v45, %v1189_v36  ;;  %1447 = vmatprep.subr.mxu0 %v852_v12 }
 0x230   :  { %v446_v48 = vpop.f32.mrf.mxu1  ;;  %1448 = vmatpush3.msra.mxu0 %v852_v12 }
 0x231   :  { %588 = vmatmul.mubr.f32.gmra.mxu0 %v466_v43  ;;  %v447_v50 = vadd.f32 %v1189_v36, %v446_v48  ;;  %v470_v55 = vmax.f32 %v452_v52, 0.0  ;;  %1449 = vmatprep.subr.mxu0 %v851_v13 }
 0x232   :  { %593 = vmatprep.mubr.f32.mxu0 %v1852_v33  ;;  %v1400_v51 = vpop.f32.mrf.mxu1  ;;  %1450 = vmatpush3.msra.mxu0 %v851_v13 }
 0x233   :  { %v469_v53 = vmax.f32 %v447_v50, 0.0  ;;  %v462_v57 = vadd.f32 %v1400_v51, %v1189_v36  ;;  %1451 = vmatprep.subr.mxu0 %v850_v14 }
 0x234   :  { %v456_v54 = vpop.f32.mrf.mxu1  ;;  %1452 = vmatpush3.msra.mxu0 %v850_v14  ;;  %v672_v14 = vld [vmem:[#allocation14 + $0x10] sm:$0xff] }
 0x235   :  { %594 = vmatmul.mubr.f32.gmra.mxu0 %v467_v47  ;;  %v457_v56 = vadd.f32 %v1189_v36, %v456_v54  ;;  %v472_v59 = vmax.f32 %v462_v57, 0.0  ;;  %1453 = vmatprep.subr.mxu0 %v849_v15 }
 0x236   :  { %599 = vmatprep.mubr.f32.mxu0 %v1852_v33  ;;  %1454 = vmatpush3.msra.mxu0 %v849_v15 }
 0x237   :  { %v471_v58 = vmax.f32 %v457_v56, 0.0  ;;  %1455 = vmatprep.subr.mxu0 %v848_v16 }
 0x238   :  { %1456 = vmatpush3.msra.mxu0 %v848_v16 }
 0x239   :  { %600 = vmatmul.mubr.f32.gmra.mxu0 %v468_v49  ;;  %1457 = vmatprep.subr.mxu0 %v847_v17 }
 0x23a   :  { %605 = vmatprep.mubr.f32.mxu0 %v1852_v33  ;;  %1458 = vmatpush3.msra.mxu0 %v847_v17 }
 0x23b   :  { %1459 = vmatprep.subr.mxu0 %v846_v18 }
 0x23c   :  { %1460 = vmatpush3.msra.mxu0 %v846_v18 }
 0x23d   :  { %606 = vmatmul.mubr.f32.gmra.mxu0 %v469_v53  ;;  %1461 = vmatprep.subr.mxu0 %v845_v19 }
 0x23e   :  { %611 = vmatprep.mubr.f32.mxu0 %v1852_v33  ;;  %1462 = vmatpush3.msra.mxu0 %v845_v19 }
 0x23f   :  { %1463 = vmatprep.subr.mxu0 %v844_v20 }
 0x240   :  { %1464 = vmatpush3.msra.mxu0 %v844_v20 }
 0x241   :  { %612 = vmatmul.mubr.f32.gmra.mxu0 %v470_v55  ;;  %1465 = vmatprep.subr.mxu0 %v843_v21 }
 0x242   :  { %617 = vmatprep.mubr.f32.mxu0 %v1852_v33  ;;  %1466 = vmatpush3.msra.mxu0 %v843_v21 }
 0x243   :  { %1467 = vmatprep.subr.mxu0 %v842_v22 }
 0x244   :  { %1468 = vmatpush3.msra.mxu0 %v842_v22 }
 0x245   :  { %618 = vmatmul.mubr.f32.gmra.mxu0 %v471_v58 }
 0x246   :  { %623 = vmatprep.mubr.f32.mxu0 %v1852_v33 }
 0x249   :  { %624 = vmatmul.mubr.f32.gmra.mxu0 %v472_v59  ;;  %v670_v59 = vld [vmem:[#allocation14] sm:$0xff] }
 0x2ed   :  { %v583_v30 = vpop.f32.mrf.mxu0 }
 0x2ee   :  { %v584_v31 = vadd.f32 %v583_v30, %v2014_v28  ;;  %v674_v30 = vld [vmem:[#allocation14 + $0x20] sm:$0xff] }
 0x2ef   :  { %v585_v32 = vpop.f32.mrf.mxu0 }
 0x2f0   :  { %630 = vst [vmem:[#allocation20] sm:$0xff] %v584_v31  ;;  %v586_v33 = vadd.f32 %v585_v32, %v2016_v29 }
 0x2f1   :  { %v589_v34 = vpop.f32.mrf.mxu0 }
 0x2f2   :  { %631 = vst [vmem:[#allocation20 + $0x8] sm:$0xff] %v586_v33  ;;  %v646_v35 = vmul.f32 0.5, %v586_v33  ;;  %v2021_v36 = vadd.f32 %v589_v34, %v2014_v28 }
 0x2f3   :  { %v591_v37 = vpop.f32.mrf.mxu0 }
 0x2f4   :  { %v654_v38 = vmul.f32 1.442695, %v646_v35  ;;  %632 = vst [vmem:[#allocation20 + $0x10] sm:$0xff] %v2021_v36  ;;  %v592_v39 = vadd.f32 %v591_v37, %v2016_v29  ;;  %v676_v37 = vld [vmem:[#allocation14 + $0x30] sm:$0xff] }
 0x2f5   :  { %v595_v40 = vpop.f32.mrf.mxu0 }
 0x2f6   :  { %1550 = vpow2.f32 %v654_v38  ;;  %633 = vst [vmem:[#allocation20 + $0x18] sm:$0xff] %v592_v39  ;;  %v647_v41 = vmul.f32 0.5, %v592_v39  ;;  %v2026_v42 = vadd.f32 %v595_v40, %v2014_v28 }
 0x2f7   :  { %v597_v43 = vpop.f32.mrf.mxu0 }
 0x2f8   :  { %v656_v44 = vmul.f32 1.442695, %v647_v41  ;;  %634 = vst [vmem:[#allocation20 + $0x20] sm:$0xff] %v2026_v42  ;;  %v598_v45 = vadd.f32 %v597_v43, %v2016_v29  ;;  %v677_v41 = vld [vmem:[#allocation14 + $0x38] sm:$0xff] }
 0x2f9   :  { %v601_v46 = vpop.f32.mrf.mxu0 }
 0x2fa   :  { %1552 = vpow2.f32 %v656_v44  ;;  %635 = vst [vmem:[#allocation20 + $0x28] sm:$0xff] %v598_v45  ;;  %v648_v47 = vmul.f32 0.5, %v598_v45  ;;  %v2031_v48 = vadd.f32 %v601_v46, %v2014_v28  ;;  %v841_v46 = vld [vmem:[#allocation11 + $0x18] sm:$0xff] }
 0x2fb   :  { %v603_v49 = vpop.f32.mrf.mxu0  ;;  %1469 = vmatprep.subr.mxu0 %v841_v46 }
 0x2fc   :  { %v658_v50 = vmul.f32 1.442695, %v648_v47  ;;  %636 = vst [vmem:[#allocation20 + $0x30] sm:$0xff] %v2031_v48  ;;  %v604_v51 = vadd.f32 %v603_v49, %v2016_v29  ;;  %1470 = vmatpush3.msra.mxu0 %v841_v46  ;;  %v840_v47 = vld [vmem:[#allocation11 + $0x10] sm:$0xff]  ;;  %v838_v49 = vld [vmem:[#allocation11] sm:$0xff] }
 0x2fd   :  { %v607_v52 = vpop.f32.mrf.mxu0  ;;  %1471 = vmatprep.subr.mxu0 %v840_v47 }
 0x2fe   :  { %1554 = vpow2.f32 %v658_v50  ;;  %637 = vst [vmem:[#allocation20 + $0x38] sm:$0xff] %v604_v51  ;;  %v649_v53 = vmul.f32 0.5, %v604_v51  ;;  %v608_v54 = vadd.f32 %v607_v52, %v2014_v28  ;;  %1472 = vmatpush3.msra.mxu0 %v840_v47  ;;  %v997_v50 = vld [vmem:[#allocation13 + $0x78] sm:$0xff]  ;;  %v996_v51 = vld [vmem:[#allocation13 + $0x70] sm:$0xff]  ;;  %v995_v52 = vld [vmem:[#allocation13 + $0x68] sm:$0xff] }
 0x2ff   :  { %v609_v55 = vpop.f32.mrf.mxu0  ;;  %1489 = vmatprep.subr.mxu1 %v997_v50  ;;  %v968_v47 = vld [vmem:[#allocation17 + $0x10] sm:$0xff] }
 0x300   :  { %v660_v56 = vmul.f32 1.442695, %v649_v53  ;;  %638 = vst [vmem:[#allocation20 + $0x40] sm:$0xff] %v608_v54  ;;  %v610_v57 = vadd.f32 %v609_v55, %v2016_v29  ;;  %v994_v53 = vld [vmem:[#allocation13 + $0x60] sm:$0xff]  ;;  %v992_v55 = vld [vmem:[#allocation13 + $0x50] sm:$0xff] }
 0x301   :  { %v613_v58 = vpop.f32.mrf.mxu0 }
 0x302   :  { %1556 = vpow2.f32 %v660_v56  ;;  %639 = vst [vmem:[#allocation20 + $0x48] sm:$0xff] %v610_v57  ;;  %v650_v60 = vmul.f32 0.5, %v610_v57  ;;  %v614_v61 = vadd.f32 %v613_v58, %v2014_v28  ;;  %v991_v56 = vld [vmem:[#allocation13 + $0x48] sm:$0xff]  ;;  %v990_v57 = vld [vmem:[#allocation13 + $0x40] sm:$0xff]  ;;  %v989_v58 = vld [vmem:[#allocation13 + $0x38] sm:$0xff] }
 0x303   :  { %v1551_v62 = vpop.eup %1550  ;;  %v615_v63 = vpop.f32.mrf.mxu0 }
 0x304   :  { %v662_v0 = vmul.f32 1.442695, %v650_v60  ;;  %640 = vst [vmem:[#allocation20 + $0x50] sm:$0xff] %v614_v61  ;;  %v616_v1 = vadd.f32 %v615_v63, %v2016_v29  ;;  %v678_v2 = vmul.f32 %v1551_v62, %v670_v59  ;;  %v988_v59 = vld [vmem:[#allocation13 + $0x30] sm:$0xff]  ;;  %v987_v60 = vld [vmem:[#allocation13 + $0x28] sm:$0xff] }
 0x305   :  { %v619_v3 = vpop.f32.mrf.mxu0  ;;  %v1190_v62 = vld [vmem:[%s2075_s8] ss:$0 sm:$0xff] }
 0x306   :  { %1558 = vpow2.f32 %v662_v0  ;;  %641 = vst [vmem:[#allocation20 + $0x58] sm:$0xff] %v616_v1  ;;  %v651_v5 = vmul.f32 0.5, %v616_v1  ;;  %v620_v6 = vadd.f32 %v619_v3, %v2014_v28  ;;  %v686_v7 = vadd.f32 %v678_v2, %v584_v31  ;;  %v822_v2 = vld [vmem:[#allocation16] sm:$0xff]  ;;  %v823_v3 = vld [vmem:[#allocation16 + $0x8] sm:$0xff] }
 0x307   :  { %v1553_v8 = vpop.eup %1552  ;;  %v621_v9 = vpop.f32.mrf.mxu0 }
 0x308   :  { %v664_v10 = vmul.f32 1.442695, %v651_v5  ;;  %642 = vst [vmem:[#allocation20 + $0x60] sm:$0xff] %v620_v6  ;;  %v622_v11 = vadd.f32 %v621_v9, %v2016_v29  ;;  %1433 = vmatprep.mubr.f32.mxu1 %v686_v7  ;;  %v679_v12 = vmul.f32 %v1553_v8, %v671_v4 }
 0x309   :  { %v625_v13 = vpop.f32.mrf.mxu0 }
 0x30a   :  { %1560 = vpow2.f32 %v664_v10  ;;  %643 = vst [vmem:[#allocation20 + $0x68] sm:$0xff] %v622_v11  ;;  %v652_v15 = vmul.f32 0.5, %v622_v11  ;;  %v626_v16 = vadd.f32 %v625_v13, %v2014_v28  ;;  %v687_v17 = vadd.f32 %v679_v12, %v2021_v36  ;;  %v824_v10 = vld [vmem:[#allocation16 + $0x10] sm:$0xff]  ;;  %v825_v11 = vld [vmem:[#allocation16 + $0x18] sm:$0xff] }
 0x30b   :  { %v1555_v18 = vpop.eup %1554  ;;  %v627_v19 = vpop.f32.mrf.mxu0 }
 0x30c   :  { %v666_v20 = vmul.f32 1.442695, %v652_v15  ;;  %644 = vst [vmem:[#allocation20 + $0x70] sm:$0xff] %v626_v16  ;;  %v628_v21 = vadd.f32 %v627_v19, %v2016_v29  ;;  %1434 = vmatmul.mubr.f32.vlgmr.msra.gmra.mxu1 %v687_v17  ;;  %v680_v22 = vmul.f32 %v1555_v18, %v672_v14  ;;  %v675_v29 = vld [vmem:[#allocation14 + $0x28] sm:$0xff]  ;;  %v826_v18 = vld [vmem:[#allocation16 + $0x20] sm:$0xff] }
 0x30d   :  { %1490 = vmatpush3.msra.mxu1 %v997_v50  ;;  %v827_v19 = vld [vmem:[#allocation16 + $0x28] sm:$0xff] }
 0x30e   :  { %1562 = vpow2.f32 %v666_v20  ;;  %645 = vst [vmem:[#allocation20 + $0x78] sm:$0xff] %v628_v21  ;;  %v653_v24 = vmul.f32 0.5, %v628_v21  ;;  %v688_v25 = vadd.f32 %v680_v22, %v2026_v42  ;;  %1491 = vmatprep.subr.mxu1 %v996_v51 }
 0x30f   :  { %v1557_v26 = vpop.eup %1556  ;;  %1492 = vmatpush3.msra.mxu1 %v996_v51 }
 0x310   :  { %v668_v27 = vmul.f32 1.442695, %v653_v24  ;;  %1436 = vmatprep.mubr.f32.mxu1 %v688_v25  ;;  %v681_v28 = vmul.f32 %v1557_v26, %v673_v23  ;;  %1493 = vmatprep.subr.mxu1 %v995_v52  ;;  %v828_v26 = vld [vmem:[#allocation16 + $0x30] sm:$0xff] }
 0x311   :  { %1494 = vmatpush3.msra.mxu1 %v995_v52 }
 0x312   :  { %1564 = vpow2.f32 %v668_v27  ;;  %v689_v31 = vadd.f32 %v681_v28, %v2031_v48  ;;  %v839_v48 = vld [vmem:[#allocation11 + $0x8] sm:$0xff]  ;;  %1495 = vmatprep.subr.mxu1 %v994_v53  ;;  %v829_v27 = vld [vmem:[#allocation16 + $0x38] sm:$0xff] }
 0x313   :  { %v1559_v32 = vpop.eup %1558  ;;  %1473 = vmatprep.subr.mxu0 %v839_v48  ;;  %1496 = vmatpush3.msra.mxu1 %v994_v53 }
 0x314   :  { %1437 = vmatmul.mubr.f32.gmra.mxu1 %v689_v31  ;;  %v682_v33 = vmul.f32 %v1559_v32, %v674_v30  ;;  %1474 = vmatpush3.msra.mxu0 %v839_v48  ;;  %v985_v32 = vld [vmem:[#allocation13 + $0x18] sm:$0xff] }
 0x315   :  { %1475 = vmatprep.subr.mxu0 %v838_v49  ;;  %v969_v48 = vld [vmem:[#allocation17 + $0x18] sm:$0xff] }
 0x316   :  { %v690_v34 = vadd.f32 %v682_v33, %v608_v54  ;;  %1476 = vmatpush3.msra.mxu0 %v838_v49  ;;  %v993_v54 = vld [vmem:[#allocation13 + $0x58] sm:$0xff]  ;;  %v984_v33 = vld [vmem:[#allocation13 + $0x10] sm:$0xff] }
 0x317   :  { %v1561_v35 = vpop.eup %1560  ;;  %1497 = vmatprep.subr.mxu1 %v993_v54 }
 0x318   :  { %1439 = vmatprep.mubr.f32.mxu1 %v690_v34  ;;  %v683_v36 = vmul.f32 %v1561_v35, %v675_v29  ;;  %1498 = vmatpush3.msra.mxu1 %v993_v54  ;;  %v983_v29 = vld [vmem:[#allocation13 + $0x8] sm:$0xff]  ;;  %v982_v34 = vld [vmem:[#allocation13] sm:$0xff] }
 0x319   :  { %1499 = vmatprep.subr.mxu1 %v992_v55  ;;  %v1191_v35 = vld [vmem:[%s2077_s10] ss:$0 sm:$0xff]  ;;  %s1853_s10 = smov [#allocation20]  }
 0x31a   :  { %v691_v38 = vadd.f32 %v683_v36, %v614_v61  ;;  %1500 = vmatpush3.msra.mxu1 %v992_v55  ;;  %v986_v61 = vld [vmem:[#allocation13 + $0x20] sm:$0xff]  ;;  %s1167_s3 = sshll.u32 %s1853_s10, 4  ;;  %s1168_s3 = int_to_ptr.vmem [resolvable:$true] %s1167_s3 }
 0x31b   :  { %v1563_v39 = vpop.eup %1562  ;;  %1501 = vmatprep.subr.mxu1 %v991_v56  ;;  %v970_v55 = vld [vmem:[#allocation17 + $0x20] sm:$0xff]  ;;  %s1782_s28 = scalar_lea.vmem %s1168_s3, 2048  ;;  %p1787_p9 = scmp.lt.s32.totalorder %s1168_s3, %s1168_s3 }
 0x31c   :  { %1440 = vmatmul.mubr.f32.gmra.mxu1 %v691_v38  ;;  %v684_v40 = vmul.f32 %v1563_v39, %v676_v37  ;;  %v966_v39 = vld [vmem:[#allocation17] sm:$0xff]  ;;  %p1783_p8 = scmp.ne.s32.totalorder %s1168_s3, %s1782_s28  ;;  %p1788_p10 = scmp.lt.s32.totalorder %s1782_s28, %s1782_s28 }
 0x31d   :  { %1502 = vmatpush3.msra.mxu1 %v991_v56  ;;  %v971_v56 = vld [vmem:[#allocation17 + $0x28] sm:$0xff] }
 0x31e   :  { %v692_v42 = vadd.f32 %v684_v40, %v620_v6  ;;  %1503 = vmatprep.subr.mxu1 %v990_v57  ;;  %v967_v40 = vld [vmem:[#allocation17 + $0x8] sm:$0xff]  ;;  %p1789_p11 = por %p1788_p10, %p1787_p9 }
 0x31f   :  { %v1565_v43 = vpop.eup %1564  ;;  %1504 = vmatpush3.msra.mxu1 %v990_v57 }
 0x320   :  { %1442 = vmatprep.mubr.f32.mxu1 %v692_v42  ;;  %v685_v44 = vmul.f32 %v1565_v43, %v677_v41  ;;  %1505 = vmatprep.subr.mxu1 %v989_v58  ;;  %p1790_p12 = pnand %p1789_p11, %p1783_p8 }
 0x321   :  { %1506 = vmatpush3.msra.mxu1 %v989_v58 }
 0x322   :  { %v693_v45 = vadd.f32 %v685_v44, %v626_v16  ;;  %1507 = vmatprep.subr.mxu1 %v988_v59 }
 0x323   :  { %1508 = vmatpush3.msra.mxu1 %v988_v59 }
 0x324   :  { %1443 = vmatmul.mubr.f32.gmra.mxu1 %v693_v45  ;;  %1509 = vmatprep.subr.mxu1 %v987_v60 }
 0x325   :  { %1510 = vmatpush3.msra.mxu1 %v987_v60 }
 0x326   :  { %1511 = vmatprep.subr.mxu1 %v986_v61 }
 0x327   :  { %1512 = vmatpush3.msra.mxu1 %v986_v61 }
 0x328   :  { %1513 = vmatprep.subr.mxu1 %v985_v32 }
 0x329   :  { %1514 = vmatpush3.msra.mxu1 %v985_v32 }
 0x32a   :  { %1515 = vmatprep.subr.mxu1 %v984_v33 }
 0x32b   :  { %1516 = vmatpush3.msra.mxu1 %v984_v33 }
 0x32c   :  { %1517 = vmatprep.subr.mxu1 %v983_v29 }
 0x32d   :  { %1518 = vmatpush3.msra.mxu1 %v983_v29 }
 0x32e   :  { %1519 = vmatprep.subr.mxu1 %v982_v34 }
 0x32f   :  { %1520 = vmatpush3.msra.mxu1 %v982_v34 }
 0x3cc   :  { %v1435_v63 = vpop.f32.mrf.mxu1 }
 0x3cd   :  { %v789_v0 = vadd.f32 %v1435_v63, %v1190_v62  ;;  %v972_v63 = vld [vmem:[#allocation17 + $0x30] sm:$0xff] }
 0x3ce   :  { %v783_v1 = vpop.f32.mrf.mxu1 }
 0x3cf   :  { %v784_v4 = vadd.f32 %v1190_v62, %v783_v1  ;;  %v831_v6 = vmul.f32 %v823_v3, %v789_v0  ;;  %v973_v0 = vld [vmem:[#allocation17 + $0x38] sm:$0xff] }
 0x3d1   :  { %v830_v5 = vmul.f32 %v822_v2, %v784_v4 }
 0x3d3   :  { %1477 = vmatprep.mubr.f32.mxu0 %v830_v5 }
 0x3d4   :  { %v1438_v7 = vpop.f32.mrf.mxu1  ;;  %1478 = vmatmul.mubr.f32.vlgmr.msra.gmra.mxu0 %v831_v6 }
 0x3d5   :  { %v799_v8 = vadd.f32 %v1438_v7, %v1190_v62 }
 0x3d6   :  { %v793_v9 = vpop.f32.mrf.mxu1 }
 0x3d7   :  { %v794_v12 = vadd.f32 %v1190_v62, %v793_v9  ;;  %v833_v14 = vmul.f32 %v825_v11, %v799_v8 }
 0x3d9   :  { %v832_v13 = vmul.f32 %v824_v10, %v794_v12 }
 0x3db   :  { %1480 = vmatprep.mubr.f32.mxu0 %v832_v13 }
 0x3dc   :  { %v1441_v15 = vpop.f32.mrf.mxu1  ;;  %1481 = vmatmul.mubr.f32.gmra.mxu0 %v833_v14 }
 0x3dd   :  { %v809_v16 = vadd.f32 %v1441_v15, %v1190_v62 }
 0x3de   :  { %v803_v17 = vpop.f32.mrf.mxu1 }
 0x3df   :  { %v804_v20 = vadd.f32 %v1190_v62, %v803_v17  ;;  %v835_v22 = vmul.f32 %v827_v19, %v809_v16 }
 0x3e1   :  { %v834_v21 = vmul.f32 %v826_v18, %v804_v20 }
 0x3e3   :  { %1483 = vmatprep.mubr.f32.mxu0 %v834_v21 }
 0x3e4   :  { %v1444_v23 = vpop.f32.mrf.mxu1  ;;  %1484 = vmatmul.mubr.f32.gmra.mxu0 %v835_v22 }
 0x3e5   :  { %v819_v24 = vadd.f32 %v1444_v23, %v1190_v62 }
 0x3e6   :  { %v813_v25 = vpop.f32.mrf.mxu1 }
 0x3e7   :  { %v814_v28 = vadd.f32 %v1190_v62, %v813_v25  ;;  %v837_v31 = vmul.f32 %v829_v27, %v819_v24 }
 0x3e9   :  { %v836_v30 = vmul.f32 %v828_v26, %v814_v28 }
 0x3eb   :  { %1486 = vmatprep.mubr.f32.mxu0 %v836_v30 }
 0x3ec   :  { %1487 = vmatmul.mubr.f32.gmra.mxu0 %v837_v31 }
 0x494   :  { %v1479_v36 = vpop.f32.mrf.mxu0 }
 0x495   :  { %v933_v37 = vadd.f32 %v1479_v36, %v1191_v35 }
 0x496   :  { %v927_v38 = vpop.f32.mrf.mxu0 }
 0x497   :  { %v928_v41 = vadd.f32 %v1191_v35, %v927_v38  ;;  %v975_v43 = vmul.f32 %v967_v40, %v933_v37 }
 0x499   :  { %v974_v42 = vmul.f32 %v966_v39, %v928_v41 }
 0x49b   :  { %1521 = vmatprep.mubr.f32.mxu1 %v974_v42 }
 0x49c   :  { %v1482_v44 = vpop.f32.mrf.mxu0  ;;  %1522 = vmatmul.mubr.f32.vlgmr.msra.gmra.mxu1 %v975_v43 }
 0x49d   :  { %v943_v45 = vadd.f32 %v1482_v44, %v1191_v35 }
 0x49e   :  { %v937_v46 = vpop.f32.mrf.mxu0 }
 0x49f   :  { %v938_v49 = vadd.f32 %v1191_v35, %v937_v46  ;;  %v977_v51 = vmul.f32 %v969_v48, %v943_v45 }
 0x4a1   :  { %v976_v50 = vmul.f32 %v968_v47, %v938_v49 }
 0x4a3   :  { %1524 = vmatprep.mubr.f32.mxu1 %v976_v50 }
 0x4a4   :  { %v1485_v52 = vpop.f32.mrf.mxu0  ;;  %1525 = vmatmul.mubr.f32.gmra.mxu1 %v977_v51 }
 0x4a5   :  { %v953_v53 = vadd.f32 %v1485_v52, %v1191_v35 }
 0x4a6   :  { %v947_v54 = vpop.f32.mrf.mxu0 }
 0x4a7   :  { %v948_v57 = vadd.f32 %v1191_v35, %v947_v54  ;;  %v979_v59 = vmul.f32 %v971_v56, %v953_v53 }
 0x4a9   :  { %v978_v58 = vmul.f32 %v970_v55, %v948_v57 }
 0x4ab   :  { %1527 = vmatprep.mubr.f32.mxu1 %v978_v58 }
 0x4ac   :  { %v1488_v60 = vpop.f32.mrf.mxu0  ;;  %1528 = vmatmul.mubr.f32.gmra.mxu1 %v979_v59 }
 0x4ad   :  { %v963_v61 = vadd.f32 %v1488_v60, %v1191_v35 }
 0x4ae   :  { %v957_v62 = vpop.f32.mrf.mxu0 }
 0x4af   :  { %v958_v1 = vadd.f32 %v1191_v35, %v957_v62  ;;  %v981_v3 = vmul.f32 %v973_v0, %v963_v61 }
 0x4b1   :  { %v980_v2 = vmul.f32 %v972_v63, %v958_v1 }
 0x4b3   :  { %1530 = vmatprep.mubr.f32.mxu1 %v980_v2 }
 0x4b4   :  { %1531 = vmatmul.mubr.f32.gmra.mxu1 %v981_v3 }
 0x4b5   :  { %1793 = shalt.err (!%p1790_p12)
}
 0x4b6   :  { %1173 = dma.vmem_to_hbm [thread:$0]  %s1168_s3, 2048, %s2084_s17, [#allocation21], %s1842_s20, %s1842_s20, %s1843_s21  }
 0x4b7   :  { %v1192_v4 = vld [vmem:[%s2079_s12] ss:$0 sm:$0xff]  ;;  %s1854_s12 = smov [#allocation19]  }
 0x4b8   :  { %s1155_s17 = sshll.u32 %s1854_s12, 4  ;;  %s1156_s17 = int_to_ptr.vmem [resolvable:$true] %s1155_s17 }
 0x4b9   :  { %s1802_s20 = scalar_lea.vmem %s1156_s17, 1024  ;;  %p1807_p0 = scmp.lt.s32.totalorder %s1156_s17, %s1156_s17 }
 0x4ba   :  { %p1803_p13 = scmp.ne.s32.totalorder %s1156_s17, %s1802_s20  ;;  %p1808_p1 = scmp.lt.s32.totalorder %s1802_s20, %s1802_s20 }
 0x4bc   :  { %p1809_p2 = por %p1808_p1, %p1807_p0 }
 0x4be   :  { %p1810_p3 = pnand %p1809_p2, %p1803_p13 }
 0x55c   :  { %v1523_v5 = vpop.f32.mrf.mxu1 }
 0x55d   :  { %v1077_v6 = vadd.f32 %v1523_v5, %v1192_v4 }
 0x55e   :  { %v1071_v7 = vpop.f32.mrf.mxu1 }
 0x55f   :  { %v1111_v8 = vmul.f32 0.5, %v1077_v6  ;;  %v1072_v9 = vadd.f32 %v1192_v4, %v1071_v7 }
 0x561   :  { %1566 = vtanh.f32 %v1111_v8  ;;  %v1110_v10 = vmul.f32 0.5, %v1072_v9 }
 0x563   :  { %1568 = vtanh.f32 %v1110_v10 }
 0x564   :  { %v1526_v11 = vpop.f32.mrf.mxu1 }
 0x565   :  { %v1087_v12 = vadd.f32 %v1526_v11, %v1192_v4 }
 0x566   :  { %v1081_v13 = vpop.f32.mrf.mxu1 }
 0x567   :  { %v1113_v14 = vmul.f32 0.5, %v1087_v12  ;;  %v1082_v15 = vadd.f32 %v1192_v4, %v1081_v13 }
 0x569   :  { %1570 = vtanh.f32 %v1113_v14  ;;  %v1112_v16 = vmul.f32 0.5, %v1082_v15 }
 0x56b   :  { %1572 = vtanh.f32 %v1112_v16 }
 0x56c   :  { %v1529_v17 = vpop.f32.mrf.mxu1 }
 0x56d   :  { %v1097_v18 = vadd.f32 %v1529_v17, %v1192_v4 }
 0x56e   :  { %v1567_v19 = vpop.eup %1566  ;;  %v1091_v20 = vpop.f32.mrf.mxu1 }
 0x56f   :  { %v1127_v21 = vmul.f32 0.5, %v1567_v19  ;;  %v1115_v22 = vmul.f32 0.5, %v1097_v18  ;;  %v1092_v23 = vadd.f32 %v1192_v4, %v1091_v20 }
 0x570   :  { %v1569_v24 = vpop.eup %1568 }
 0x571   :  { %v1135_v25 = vadd.f32 0.5, %v1127_v21  ;;  %v1126_v26 = vmul.f32 0.5, %v1569_v24  ;;  %1574 = vtanh.f32 %v1115_v22  ;;  %v1114_v27 = vmul.f32 0.5, %v1092_v23 }
 0x573   :  { %1143 = vst [vmem:[#allocation19 + $0x8] sm:$0xff] %v1135_v25  ;;  %v1134_v28 = vadd.f32 0.5, %v1126_v26  ;;  %1576 = vtanh.f32 %v1114_v27 }
 0x574   :  { %v1532_v30 = vpop.f32.mrf.mxu1 }
 0x575   :  { %1142 = vst [vmem:[#allocation19] sm:$0xff] %v1134_v28  ;;  %v1107_v31 = vadd.f32 %v1532_v30, %v1192_v4 }
 0x576   :  { %v1571_v32 = vpop.eup %1570  ;;  %v1101_v33 = vpop.f32.mrf.mxu1 }
 0x577   :  { %v1129_v29 = vmul.f32 0.5, %v1571_v32  ;;  %v1117_v34 = vmul.f32 0.5, %v1107_v31  ;;  %v1102_v35 = vadd.f32 %v1192_v4, %v1101_v33 }
 0x578   :  { %v1573_v36 = vpop.eup %1572 }
 0x579   :  { %v1137_v37 = vadd.f32 0.5, %v1129_v29  ;;  %v1128_v38 = vmul.f32 0.5, %v1573_v36  ;;  %1578 = vtanh.f32 %v1117_v34  ;;  %v1116_v39 = vmul.f32 0.5, %v1102_v35 }
 0x57b   :  { %1145 = vst [vmem:[#allocation19 + $0x18] sm:$0xff] %v1137_v37  ;;  %v1136_v40 = vadd.f32 0.5, %v1128_v38  ;;  %1580 = vtanh.f32 %v1116_v39 }
 0x57d   :  { %1144 = vst [vmem:[#allocation19 + $0x10] sm:$0xff] %v1136_v40 }
 0x57e   :  { %v1575_v41 = vpop.eup %1574 }
 0x57f   :  { %v1131_v42 = vmul.f32 0.5, %v1575_v41 }
 0x580   :  { %v1577_v43 = vpop.eup %1576 }
 0x581   :  { %v1139_v44 = vadd.f32 0.5, %v1131_v42  ;;  %v1130_v45 = vmul.f32 0.5, %v1577_v43 }
 0x583   :  { %1147 = vst [vmem:[#allocation19 + $0x28] sm:$0xff] %v1139_v44  ;;  %v1138_v46 = vadd.f32 0.5, %v1130_v45 }
 0x585   :  { %1146 = vst [vmem:[#allocation19 + $0x20] sm:$0xff] %v1138_v46 }
 0x586   :  { %v1579_v47 = vpop.eup %1578 }
 0x587   :  { %v1133_v48 = vmul.f32 0.5, %v1579_v47 }
 0x588   :  { %v1581_v49 = vpop.eup %1580 }
 0x589   :  { %v1141_v50 = vadd.f32 0.5, %v1133_v48  ;;  %v1132_v51 = vmul.f32 0.5, %v1581_v49 }
 0x58b   :  { %1149 = vst [vmem:[#allocation19 + $0x38] sm:$0xff] %v1141_v50  ;;  %v1140_v52 = vadd.f32 0.5, %v1132_v51 }
 0x58d   :  { %1148 = vst [vmem:[#allocation19 + $0x30] sm:$0xff] %v1140_v52 }
 0x58e   :  { %1813 = shalt.err (!%p1810_p3)
}
 0x58f   :  { %1161 = dma.vmem_to_hbm [thread:$0]  %s1156_s17, 1024, %s2083_s16, [#allocation4], %s1840_s29, %s1840_s29, %s1841_s0  }
 0x590   :  { %1834 = dma.done.wait [#allocation4], 1024  }
 0x591   :  { %1835 = vsyncadd [#allocation4], 4294966272 }
 0x592   :  { %1836 = dma.done.wait [#allocation21], 2048  }
 0x593   :  { %1837 = vsyncadd [#allocation21], 4294965248 }
 0x594   :  { %1180 = vsyncpa [#allocation3], 1 }
 0x595   :  { %1181 = vsyncpa [#allocation6], 1 }
 0x596   :  { %1182 = vsyncpa [#allocation9], 1 }
 0x597   :  { %1183 = vsyncpa [#allocation12], 1 }
 0x598   :  { %1184 = vsyncpa [#allocation15], 1 }
 0x599   :  { %1185 = vsyncpa [#allocation18], 1 }
 0x59a   :  { %1186 = vsyncpa [#allocation4], 1 }
 0x59b   :  { %1187 = vsyncpa [#allocation21], 1 }

</bundles_post_ra>
